<compile_context>
chip_gen: v7x
topology: tpu7x:2x2x1
jax: 0.10.0
libtpu: 0.0.40
codegen_flags: <defaults>
</compile_context>

<pallas_src>
import math
from functools import partial

import jax
import jax.numpy as jnp
from jax.experimental import pallas as pl
from jax.experimental.pallas import tpu as pltpu


# ---------------------------------------------------------------------------
# hparams (small, consistent with the module)
# ---------------------------------------------------------------------------
HPARAMS = dict(
    hidden_size=32,          # M (= encoder_hidden = in_dims)
    residual_channels=32,    # C
    residual_layers=4,       # L
    dilation_cycle_length=2,
)
B = 2       # batch
T = 16      # sequence length


def _mish(h):
    # numerically-safe softplus, then Mish = x * tanh(softplus(x))
    sp = jnp.maximum(h, 0.0) + jnp.log1p(jnp.exp(-jnp.abs(h)))
    return h * jnp.tanh(sp)


# ---------------------------------------------------------------------------
# weight-slab packing: stack 2D blocks along rows (sublanes), pad each block's
# row count to a multiple of 8 so every block starts sublane-aligned.
# ---------------------------------------------------------------------------
def _pack_rows(entries, width):
    offs = {}
    blocks = []
    r = 0
    for name, a in entries:
        a = jnp.asarray(a, jnp.float32)
        rows, cols = a.shape
        rows_pad = -(-rows // 8) * 8
        blocks.append(jnp.pad(a, ((0, rows_pad - rows), (0, width - cols))))
        offs[name] = (r, rows, cols)
        r += rows_pad
    return jnp.concatenate(blocks, axis=0), offs


# ---------------------------------------------------------------------------
# Pallas kernel: whole DiffNet forward, all batches fused, single invocation.
# ---------------------------------------------------------------------------
def _diffnet_kernel(Bn, Tn, M, C, L, cyc, offsA, offsB,
                    x0_ref, cond_ref, demb_ref, wA_ref, wB_ref, out_ref):
    BT = Bn * Tn
    LC = L * C

    def rdA(name):
        r, n, c = offsA[name]
        return wA_ref[r:r + n, 0:c]

    def rdB(name):
        r, n, c = offsB[name]
        return wB_ref[r:r + n, 0:c]

    def dot(a, b):
        return jnp.dot(a, b, preferred_element_type=jnp.float32)

    x0 = x0_ref[...]       # [BT, M]   (batch folded onto rows)
    cond = cond_ref[...]   # [BT, M]
    demb = demb_ref[...]   # [B, C]    sinusoidal step embedding

    # diffusion-step MLP:  Linear(C,4C) -> Mish -> Linear(4C,C)
    h = dot(demb, rdA('mlp_w1')) + rdA('mlp_b1')
    h = _mish(h)
    dstep = dot(h, rdB('mlp_w2')) + rdB('mlp_b2')                 # [B, C]

    # all layers' diffusion-step projections in one matmul, then broadcast
    # each batch row over its T time steps -> [BT, L*C]
    dproj_all = dot(dstep, rdA('dp_w_all')) + rdA('dp_b_all')     # [B, L*C]
    dproj_bt = jnp.concatenate(
        [jnp.broadcast_to(dproj_all[b:b + 1, :], (Tn, LC)) for b in range(Bn)],
        axis=0)                                                   # [BT, L*C]

    # all layers' conditioner projections in one matmul per gate/filter half
    # (dilated-conv bias already folded into these biases by the wrapper)
    cg_all = dot(cond, rdA('cp_wg_all')) + rdA('cpg_b_all')       # [BT, L*C]
    cf_all = dot(cond, rdA('cp_wf_all')) + rdA('cpf_b_all')       # [BT, L*C]

    # input projection (1x1 conv) + relu
    x = jnp.maximum(dot(x0, rdB('in_w')) + rdB('in_b'), 0.0)      # [BT, C]

    # local time index of each fused row (masks the dilated conv so shifts
    # never leak across batch boundaries)
    t_loc = jax.lax.broadcasted_iota(jnp.int32, (BT, C), 0) % Tn

    op_b_res = rdB('op_b_res')      # [L, C]
    op_b_skip = rdB('op_b_skip')    # [L, C]

    skip_acc = jnp.zeros((BT, C), jnp.float32)
    inv_sqrt2 = 1.0 / math.sqrt(2.0)

    # residual layers (statically unrolled; dilation is a Python constant)
    for l in range(L):
        dil = 2 ** (l % cyc)
        y = x + dproj_bt[:, l * C:(l + 1) * C]                    # [BT, C]

        # dilated conv, kernel=3, "same" length:
        #   out[t] = Wk0 . y[t-dil] + Wk1 . y[t] + Wk2 . y[t+dil]
        y_prev = jnp.where(t_loc >= dil, jnp.roll(y, dil, axis=0), 0.0)
        y_next = jnp.where(t_loc < Tn - dil, jnp.roll(y, -dil, axis=0), 0.0)
        y_cat = jnp.concatenate([y_prev, y, y_next], axis=1)      # [BT, 3C]

        gate = dot(y_cat, rdB(f'dil_wg_{l}')) + cg_all[:, l * C:(l + 1) * C]
        filt = dot(y_cat, rdB(f'dil_wf_{l}')) + cf_all[:, l * C:(l + 1) * C]
        z = (1.0 / (1.0 + jnp.exp(-gate))) * jnp.tanh(filt)       # [BT, C]

        res = dot(z, rdB(f'op_wr_{l}')) + op_b_res[l:l + 1, :]
        skp = dot(z, rdB(f'op_ws_{l}')) + op_b_skip[l:l + 1, :]

        x = (x + res) * inv_sqrt2
        skip_acc = skip_acc + skp

    s = skip_acc * (1.0 / math.sqrt(L))
    s = jnp.maximum(dot(s, rdB('skip_w')) + rdB('skip_b'), 0.0)
    out_ref[...] = dot(s, rdB('fin_w')) + rdB('fin_b')            # [BT, M]


# ---------------------------------------------------------------------------
# wrapper: layout transforms, weight packing, sinusoidal embedding, pallas_call
# ---------------------------------------------------------------------------
def diffnet_pallas(spec, diffusion_step, cond, params, hp):
    M = hp['hidden_size']
    C = hp['residual_channels']
    L = hp['residual_layers']
    cyc = hp['dilation_cycle_length']
    Bn, _, _, Tn = spec.shape
    BT = Bn * Tn
    LC = L * C
    p = params

    # sinusoidal positional embedding of the diffusion step (parameter-free glue)
    half = C // 2
    scale = math.log(10000) / (half - 1)
    freqs = jnp.exp(jnp.arange(half, dtype=jnp.float32) * -scale)
    demb = diffusion_step.astype(jnp.float32)[:, None] * freqs[None, :]
    demb = jnp.concatenate([jnp.sin(demb), jnp.cos(demb)], axis=-1)      # [B, C]

    # channels-last, batch folded onto the row (sublane) axis
    x0 = jnp.transpose(spec[:, 0], (0, 2, 1)).reshape(BT, M)             # [BT, M]
    cond_bt = jnp.transpose(cond, (0, 2, 1)).reshape(BT, M)              # [BT, M]

    dil_w = p['dil_w']                 # [L, 2C, C, 3]
    dil_b = p['dil_b']                 # [L, 2C]
    cp_w = p['cp_w'][:, :, :, 0]       # [L, 2C, M]
    cp_b = p['cp_b']                   # [L, 2C]
    op_w = p['op_w'][:, :, :, 0]       # [L, 2C, C]
    op_b = p['op_b']                   # [L, 2C]
    dp_w = p['dp_w']                   # [L, C, C]
    dp_b = p['dp_b']                   # [L, C]

    # layer-batched (columns) projection weights
    dp_w_all = jnp.concatenate([dp_w[l].T for l in range(L)], axis=1)          # [C, L*C]
    dp_b_all = jnp.concatenate([dp_b[l] for l in range(L)])[None]              # [1, L*C]
    cp_wg_all = jnp.concatenate([cp_w[l, :C].T for l in range(L)], axis=1)     # [M, L*C]
    cp_wf_all = jnp.concatenate([cp_w[l, C:].T for l in range(L)], axis=1)     # [M, L*C]
    # fold dilated-conv bias into the conditioner-projection bias
    cpg_b_all = jnp.concatenate([cp_b[l, :C] + dil_b[l, :C] for l in range(L)])[None]
    cpf_b_all = jnp.concatenate([cp_b[l, C:] + dil_b[l, C:] for l in range(L)])[None]

    entriesA = [
        ('mlp_w1', p['mlp_w1'].T),        # [C, 4C]
        ('dp_w_all', dp_w_all),
        ('cp_wg_all', cp_wg_all),
        ('cp_wf_all', cp_wf_all),
        ('mlp_b1', p['mlp_b1'][None]),
        ('dp_b_all', dp_b_all),
        ('cpg_b_all', cpg_b_all),
        ('cpf_b_all', cpf_b_all),
    ]

    entriesB = [
        ('in_w', p['in_w'][:, :, 0].T),   # [M, C]
        ('in_b', p['in_b'][None]),
        ('mlp_w2', p['mlp_w2'].T),        # [4C, C]
        ('mlp_b2', p['mlp_b2'][None]),
        ('skip_w', p['skip_w'][:, :, 0].T),
        ('skip_b', p['skip_b'][None]),
        ('fin_w', p['fin_w'][:, :, 0].T),  # [C, M]
        ('fin_b', p['fin_b'][None]),
        ('op_b_res', op_b[:, :C]),        # [L, C]
        ('op_b_skip', op_b[:, C:]),       # [L, C]
    ]
    for l in range(L):
        # taps stacked along K to match concat([y_prev, y, y_next], axis=-1)
        entriesB.append((f'dil_wg_{l}',
                         jnp.transpose(dil_w[l, :C], (2, 1, 0)).reshape(3 * C, C)))
        entriesB.append((f'dil_wf_{l}',
                         jnp.transpose(dil_w[l, C:], (2, 1, 0)).reshape(3 * C, C)))
        entriesB.append((f'op_wr_{l}', op_w[l, :C].T))   # [C, C]
        entriesB.append((f'op_ws_{l}', op_w[l, C:].T))   # [C, C]

    WA = max(4 * C, LC)
    WB = max(C, M)
    slabA, offsA = _pack_rows(entriesA, WA)
    slabB, offsB = _pack_rows(entriesB, WB)

    vmem = pl.BlockSpec(memory_space=pltpu.MemorySpace.VMEM)
    out = pl.pallas_call(
        partial(_diffnet_kernel, Bn, Tn, M, C, L, cyc, offsA, offsB),
        out_shape=jax.ShapeDtypeStruct((BT, M), jnp.float32),
        in_specs=[vmem, vmem, vmem, vmem, vmem],
        out_specs=vmem,
    )(x0, cond_bt, demb, slabA, slabB)

    # back to torch layout [B, 1, M, T]
    out = out.reshape(Bn, Tn, M)
    return jnp.transpose(out, (0, 2, 1))[:, None, :, :]


# ---------------------------------------------------------------------------
# pure-JAX reference (torch-equivalent NCT layout) for a correctness check
# ---------------------------------------------------------------------------
def _conv1d_ref(x, w, b, dilation=1, padding=0):
    y = jax.lax.conv_general_dilated(
        x, w, window_strides=(1,), padding=[(padding, padding)],
        rhs_dilation=(dilation,), dimension_numbers=('NCH', 'OIH', 'NCH'))
    return y + b[None, :, None]


def diffnet_reference(spec, diffusion_step, cond, params, hp):
    M = hp['hidden_size']
    C = hp['residual_channels']
    L = hp['residual_layers']
    cyc = hp['dilation_cycle_length']
    p = params

    x = spec[:, 0]                                                   # [B, M, T]
    x = _conv1d_ref(x, p['in_w'], p['in_b'])
    x = jnp.maximum(x, 0.0)                                          # [B, C, T]

    half = C // 2
    scale = math.log(10000) / (half - 1)
    freqs = jnp.exp(jnp.arange(half, dtype=jnp.float32) * -scale)
    d = diffusion_step.astype(jnp.float32)[:, None] * freqs[None, :]
    d = jnp.concatenate([jnp.sin(d), jnp.cos(d)], axis=-1)           # [B, C]
    h = d @ p['mlp_w1'].T + p['mlp_b1']
    h = _mish(h)
    d = h @ p['mlp_w2'].T + p['mlp_b2']                              # [B, C]

    skips = []
    for l in range(L):
        dil = 2 ** (l % cyc)
        dproj = (d @ p['dp_w'][l].T + p['dp_b'][l])[:, :, None]      # [B, C, 1]
        cproj = _conv1d_ref(cond, p['cp_w'][l], p['cp_b'][l])        # [B, 2C, T]
        y = x + dproj
        y = _conv1d_ref(y, p['dil_w'][l], p['dil_b'][l], dilation=dil, padding=dil) + cproj
        gate, filt = y[:, :C], y[:, C:]
        y = (1.0 / (1.0 + jnp.exp(-gate))) * jnp.tanh(filt)
        y = _conv1d_ref(y, p['op_w'][l], p['op_b'][l])
        residual, skip = y[:, :C], y[:, C:]
        x = (x + residual) / math.sqrt(2.0)
        skips.append(skip)

    x = sum(skips) / math.sqrt(L)
    x = jnp.maximum(_conv1d_ref(x, p['skip_w'], p['skip_b']), 0.0)
    x = _conv1d_ref(x, p['fin_w'], p['fin_b'])
    return x[:, None, :, :]


# ---------------------------------------------------------------------------
# deterministic parameter init (shapes follow the torch module __init__)
# ---------------------------------------------------------------------------
def init_params(key, hp):
    M = hp['hidden_size']
    C = hp['residual_channels']
    L = hp['residual_layers']
    ks = jax.random.split(key, 24)

    def w(k, shape, s=0.2):
        return (s * jax.random.normal(k, shape)).astype(jnp.float32)

    # NOTE: torch zero-inits the final output_projection weight; here we use a
    # small random weight so the end-to-end numerical check exercises the full path.
    return dict(
        in_w=w(ks[0], (C, M, 1)), in_b=w(ks[1], (C,)),
        mlp_w1=w(ks[2], (4 * C, C)), mlp_b1=w(ks[3], (4 * C,)),
        mlp_w2=w(ks[4], (C, 4 * C)), mlp_b2=w(ks[5], (C,)),
        dil_w=w(ks[6], (L, 2 * C, C, 3)), dil_b=w(ks[7], (L, 2 * C)),
        dp_w=w(ks[8], (L, C, C)), dp_b=w(ks[9], (L, C)),
        cp_w=w(ks[10], (L, 2 * C, M, 1)), cp_b=w(ks[11], (L, 2 * C)),
        op_w=w(ks[12], (L, 2 * C, C, 1)), op_b=w(ks[13], (L, 2 * C)),
        skip_w=w(ks[14], (C, C, 1)), skip_b=w(ks[15], (C,)),
        fin_w=w(ks[16], (M, C, 1)), fin_b=w(ks[17], (M,)),
    )


if __name__ == "__main__":
    hp = HPARAMS
    M = hp['hidden_size']

    key = jax.random.PRNGKey(0)
    kp, k1, k2, k3 = jax.random.split(key, 4)
    params = init_params(kp, hp)

    spec = jax.random.normal(k1, (B, 1, M, T), dtype=jnp.float32)
    cond = jax.random.normal(k2, (B, M, T), dtype=jnp.float32)
    diffusion_step = jax.random.randint(k3, (B,), 0, 100).astype(jnp.float32)

    out = diffnet_pallas(spec, diffusion_step, cond, params, hp)
    out = jax.block_until_ready(out)

    ref = jax.block_until_ready(diffnet_reference(spec, diffusion_step, cond, params, hp))

    assert out.shape == (B, 1, M, T), out.shape
    assert jnp.allclose(out, ref, atol=1e-4, rtol=1e-4), \
        f"max abs err = {jnp.max(jnp.abs(out - ref))}"
    print("KERNEL_OK")
</pallas_src>

<mosaic_0001>
module attributes {stable_mosaic.version = 11 : i64} {
  func.func @_diffnet_kernel(%arg0: memref<32x32xf32, #tpu.memory_space<vmem>>, %arg1: memref<32x32xf32, #tpu.memory_space<vmem>>, %arg2: memref<2x32xf32, #tpu.memory_space<vmem>>, %arg3: memref<160x128xf32, #tpu.memory_space<vmem>>, %arg4: memref<1296x32xf32, #tpu.memory_space<vmem>>, %arg5: memref<32x32xf32, #tpu.memory_space<vmem>>) attributes {dimension_semantics = [], scalar_prefetch = 0 : i64, scratch_operands = 0 : i64, tpu.core_type = #tpu.core_type<tc>} {
    %c0 = arith.constant 0 : index
    %c0_0 = arith.constant 0 : index
    %0 = vector.load %arg0[%c0, %c0_0] : memref<32x32xf32, #tpu.memory_space<vmem>>, vector<32x32xf32>
    %c0_1 = arith.constant 0 : index
    %c0_2 = arith.constant 0 : index
    %1 = vector.load %arg1[%c0_1, %c0_2] : memref<32x32xf32, #tpu.memory_space<vmem>>, vector<32x32xf32>
    %c0_3 = arith.constant 0 : index
    %c0_4 = arith.constant 0 : index
    %2 = vector.load %arg2[%c0_3, %c0_4] : memref<2x32xf32, #tpu.memory_space<vmem>>, vector<2x32xf32>
    %c0_5 = arith.constant 0 : index
    %c0_6 = arith.constant 0 : index
    %3 = vector.load %arg3[%c0_5, %c0_6] : memref<160x128xf32, #tpu.memory_space<vmem>>, vector<32x128xf32>
    %cst = arith.constant dense<0.000000e+00> : vector<2x128xf32>
    %4 = tpu.matmul %2, %3, %cst {dimension_numbers = #tpu.dot_dimension_numbers<[1], [0], [0], [1], [0, 0, 1, 1], [], []>} : vector<2x32xf32>, vector<32x128xf32>, vector<2x128xf32> -> vector<2x128xf32>
    %c128 = arith.constant 128 : index
    %c0_7 = arith.constant 0 : index
    %5 = vector.load %arg3[%c128, %c0_7] : memref<160x128xf32, #tpu.memory_space<vmem>>, vector<1x128xf32>
    %6 = vector.broadcast %5 : vector<1x128xf32> to vector<2x128xf32>
    %7 = arith.addf %4, %6 : vector<2x128xf32>
    %cst_8 = arith.constant 0.000000e+00 : f32
    %8 = vector.broadcast %cst_8 : f32 to vector<2x128xf32>
    %9 = arith.maximumf %7, %8 : vector<2x128xf32>
    %10 = math.absf %7 : vector<2x128xf32>
    %cst_9 = arith.constant 0.000000e+00 : f32
    %11 = vector.broadcast %cst_9 : f32 to vector<2x128xf32>
    %12 = arith.subf %11, %10 : vector<2x128xf32>
    %13 = math.exp %12 : vector<2x128xf32>
    %14 = math.log1p %13 : vector<2x128xf32>
    %15 = arith.addf %9, %14 : vector<2x128xf32>
    %16 = math.tanh %15 : vector<2x128xf32>
    %17 = arith.mulf %7, %16 : vector<2x128xf32>
    %c40 = arith.constant 40 : index
    %c0_10 = arith.constant 0 : index
    %18 = vector.load %arg4[%c40, %c0_10] : memref<1296x32xf32, #tpu.memory_space<vmem>>, vector<128x32xf32>
    %cst_11 = arith.constant dense<0.000000e+00> : vector<2x32xf32>
    %19 = tpu.matmul %17, %18, %cst_11 {dimension_numbers = #tpu.dot_dimension_numbers<[1], [0], [0], [1], [0, 0, 1, 1], [], []>} : vector<2x128xf32>, vector<128x32xf32>, vector<2x32xf32> -> vector<2x32xf32>
    %c168 = arith.constant 168 : index
    %c0_12 = arith.constant 0 : index
    %20 = vector.load %arg4[%c168, %c0_12] : memref<1296x32xf32, #tpu.memory_space<vmem>>, vector<1x32xf32>
    %21 = vector.broadcast %20 : vector<1x32xf32> to vector<2x32xf32>
    %22 = arith.addf %19, %21 : vector<2x32xf32>
    %c32 = arith.constant 32 : index
    %c0_13 = arith.constant 0 : index
    %23 = vector.load %arg3[%c32, %c0_13] : memref<160x128xf32, #tpu.memory_space<vmem>>, vector<32x128xf32>
    %cst_14 = arith.constant dense<0.000000e+00> : vector<2x128xf32>
    %24 = tpu.matmul %22, %23, %cst_14 {dimension_numbers = #tpu.dot_dimension_numbers<[1], [0], [0], [1], [0, 0, 1, 1], [], []>} : vector<2x32xf32>, vector<32x128xf32>, vector<2x128xf32> -> vector<2x128xf32>
    %c136 = arith.constant 136 : index
    %c0_15 = arith.constant 0 : index
    %25 = vector.load %arg3[%c136, %c0_15] : memref<160x128xf32, #tpu.memory_space<vmem>>, vector<1x128xf32>
    %26 = vector.broadcast %25 : vector<1x128xf32> to vector<2x128xf32>
    %27 = arith.addf %24, %26 : vector<2x128xf32>
    %28 = vector.extract_strided_slice %27 {offsets = [0, 0], sizes = [1, 128], strides = [1, 1]} : vector<2x128xf32> to vector<1x128xf32>
    %29 = vector.shape_cast %28 : vector<1x128xf32> to vector<1x128xf32>
    %30 = vector.broadcast %29 : vector<1x128xf32> to vector<16x128xf32>
    %31 = vector.extract_strided_slice %27 {offsets = [1, 0], sizes = [1, 128], strides = [1, 1]} : vector<2x128xf32> to vector<1x128xf32>
    %32 = vector.shape_cast %31 : vector<1x128xf32> to vector<1x128xf32>
    %33 = vector.broadcast %32 : vector<1x128xf32> to vector<16x128xf32>
    %34 = tpu.concatenate %30, %33 in 0 : vector<16x128xf32>, vector<16x128xf32> -> vector<32x128xf32>
    %c64 = arith.constant 64 : index
    %c0_16 = arith.constant 0 : index
    %35 = vector.load %arg3[%c64, %c0_16] : memref<160x128xf32, #tpu.memory_space<vmem>>, vector<32x128xf32>
    %cst_17 = arith.constant dense<0.000000e+00> : vector<32x128xf32>
    %36 = tpu.matmul %1, %35, %cst_17 {dimension_numbers = #tpu.dot_dimension_numbers<[1], [0], [0], [1], [0, 0, 1, 1], [], []>} : vector<32x32xf32>, vector<32x128xf32>, vector<32x128xf32> -> vector<32x128xf32>
    %c144 = arith.constant 144 : index
    %c0_18 = arith.constant 0 : index
    %37 = vector.load %arg3[%c144, %c0_18] : memref<160x128xf32, #tpu.memory_space<vmem>>, vector<1x128xf32>
    %38 = vector.broadcast %37 : vector<1x128xf32> to vector<32x128xf32>
    %39 = arith.addf %36, %38 : vector<32x128xf32>
    %c96 = arith.constant 96 : index
    %c0_19 = arith.constant 0 : index
    %40 = vector.load %arg3[%c96, %c0_19] : memref<160x128xf32, #tpu.memory_space<vmem>>, vector<32x128xf32>
    %cst_20 = arith.constant dense<0.000000e+00> : vector<32x128xf32>
    %41 = tpu.matmul %1, %40, %cst_20 {dimension_numbers = #tpu.dot_dimension_numbers<[1], [0], [0], [1], [0, 0, 1, 1], [], []>} : vector<32x32xf32>, vector<32x128xf32>, vector<32x128xf32> -> vector<32x128xf32>
    %c152 = arith.constant 152 : index
    %c0_21 = arith.constant 0 : index
    %42 = vector.load %arg3[%c152, %c0_21] : memref<160x128xf32, #tpu.memory_space<vmem>>, vector<1x128xf32>
    %43 = vector.broadcast %42 : vector<1x128xf32> to vector<32x128xf32>
    %44 = arith.addf %41, %43 : vector<32x128xf32>
    %c0_22 = arith.constant 0 : index
    %c0_23 = arith.constant 0 : index
    %45 = vector.load %arg4[%c0_22, %c0_23] : memref<1296x32xf32, #tpu.memory_space<vmem>>, vector<32x32xf32>
    %cst_24 = arith.constant dense<0.000000e+00> : vector<32x32xf32>
    %46 = tpu.matmul %0, %45, %cst_24 {dimension_numbers = #tpu.dot_dimension_numbers<[1], [0], [0], [1], [0, 0, 1, 1], [], []>} : vector<32x32xf32>, vector<32x32xf32>, vector<32x32xf32> -> vector<32x32xf32>
    %c32_25 = arith.constant 32 : index
    %c0_26 = arith.constant 0 : index
    %47 = vector.load %arg4[%c32_25, %c0_26] : memref<1296x32xf32, #tpu.memory_space<vmem>>, vector<1x32xf32>
    %48 = vector.broadcast %47 : vector<1x32xf32> to vector<32x32xf32>
    %49 = arith.addf %46, %48 : vector<32x32xf32>
    %cst_27 = arith.constant 0.000000e+00 : f32
    %50 = vector.broadcast %cst_27 : f32 to vector<32x32xf32>
    %51 = arith.maximumf %49, %50 : vector<32x32xf32>
    %52 = tpu.iota {dimensions = array<i32: 0>} : vector<32x32xi32>
    %c16_i32 = arith.constant 16 : i32
    %c0_i32 = arith.constant 0 : i32
    %53 = arith.cmpi eq, %c16_i32, %c0_i32 : i32
    %c1_i32 = arith.constant 1 : i32
    %54 = arith.select %53, %c1_i32, %c16_i32 : i32
    %55 = vector.broadcast %54 : i32 to vector<32x32xi32>
    %56 = arith.remsi %52, %55 : vector<32x32xi32>
    %c0_i32_28 = arith.constant 0 : i32
    %57 = vector.broadcast %c0_i32_28 : i32 to vector<32x32xi32>
    %58 = arith.cmpi ne, %56, %57 : vector<32x32xi32>
    %c0_i32_29 = arith.constant 0 : i32
    %59 = vector.broadcast %c0_i32_29 : i32 to vector<32x32xi32>
    %60 = arith.cmpi slt, %56, %59 : vector<32x32xi32>
    %c0_i32_30 = arith.constant 0 : i32
    %61 = arith.cmpi slt, %54, %c0_i32_30 : i32
    %62 = vector.broadcast %61 : i1 to vector<32x32xi1>
    %63 = vector.broadcast %62 : vector<32x32xi1> to vector<32x32xi1>
    %64 = arith.xori %60, %63 : vector<32x32xi1>
    %65 = arith.andi %64, %58 : vector<32x32xi1>
    %66 = vector.broadcast %54 : i32 to vector<32x32xi32>
    %67 = arith.addi %56, %66 : vector<32x32xi32>
    %68 = arith.select %65, %67, %56 : vector<32x32xi1>, vector<32x32xi32>
    %c256 = arith.constant 256 : index
    %c0_31 = arith.constant 0 : index
    %69 = vector.load %arg4[%c256, %c0_31] : memref<1296x32xf32, #tpu.memory_space<vmem>>, vector<4x32xf32>
    %c264 = arith.constant 264 : index
    %c0_32 = arith.constant 0 : index
    %70 = vector.load %arg4[%c264, %c0_32] : memref<1296x32xf32, #tpu.memory_space<vmem>>, vector<4x32xf32>
    %cst_33 = arith.constant 0.000000e+00 : f32
    %71 = vector.broadcast %cst_33 : f32 to vector<32x32xf32>
    %72 = vector.extract_strided_slice %34 {offsets = [0, 0], sizes = [32, 32], strides = [1, 1]} : vector<32x128xf32> to vector<32x32xf32>
    %73 = arith.addf %51, %72 : vector<32x32xf32>
    %c1_i32_34 = arith.constant 1 : i32
    %74 = vector.broadcast %c1_i32_34 : i32 to vector<32x32xi32>
    %75 = arith.cmpi sge, %68, %74 : vector<32x32xi32>
    %76 = vector.extract_strided_slice %73 {offsets = [31, 0], sizes = [1, 32], strides = [1, 1]} : vector<32x32xf32> to vector<1x32xf32>
    %77 = vector.extract_strided_slice %73 {offsets = [0, 0], sizes = [31, 32], strides = [1, 1]} : vector<32x32xf32> to vector<31x32xf32>
    %78 = tpu.concatenate %76, %77 in 0 : vector<1x32xf32>, vector<31x32xf32> -> vector<32x32xf32>
    %cst_35 = arith.constant 0.000000e+00 : f32
    %79 = vector.broadcast %cst_35 : f32 to vector<32x32xf32>
    %80 = arith.select %75, %78, %79 : vector<32x32xi1>, vector<32x32xf32>
    %c15_i32 = arith.constant 15 : i32
    %81 = vector.broadcast %c15_i32 : i32 to vector<32x32xi32>
    %82 = arith.cmpi slt, %68, %81 : vector<32x32xi32>
    %83 = vector.extract_strided_slice %73 {offsets = [1, 0], sizes = [31, 32], strides = [1, 1]} : vector<32x32xf32> to vector<31x32xf32>
    %84 = vector.extract_strided_slice %73 {offsets = [0, 0], sizes = [1, 32], strides = [1, 1]} : vector<32x32xf32> to vector<1x32xf32>
    %85 = tpu.concatenate %83, %84 in 0 : vector<31x32xf32>, vector<1x32xf32> -> vector<32x32xf32>
    %cst_36 = arith.constant 0.000000e+00 : f32
    %86 = vector.broadcast %cst_36 : f32 to vector<32x32xf32>
    %87 = arith.select %82, %85, %86 : vector<32x32xi1>, vector<32x32xf32>
    %88 = tpu.concatenate %80, %73, %87 in 1 : vector<32x32xf32>, vector<32x32xf32>, vector<32x32xf32> -> vector<32x96xf32>
    %c272 = arith.constant 272 : index
    %c0_37 = arith.constant 0 : index
    %89 = vector.load %arg4[%c272, %c0_37] : memref<1296x32xf32, #tpu.memory_space<vmem>>, vector<96x32xf32>
    %cst_38 = arith.constant dense<0.000000e+00> : vector<32x32xf32>
    %90 = tpu.matmul %88, %89, %cst_38 {dimension_numbers = #tpu.dot_dimension_numbers<[1], [0], [0], [1], [0, 0, 1, 1], [], []>} : vector<32x96xf32>, vector<96x32xf32>, vector<32x32xf32> -> vector<32x32xf32>
    %91 = vector.extract_strided_slice %39 {offsets = [0, 0], sizes = [32, 32], strides = [1, 1]} : vector<32x128xf32> to vector<32x32xf32>
    %92 = arith.addf %90, %91 : vector<32x32xf32>
    %c368 = arith.constant 368 : index
    %c0_39 = arith.constant 0 : index
    %93 = vector.load %arg4[%c368, %c0_39] : memref<1296x32xf32, #tpu.memory_space<vmem>>, vector<96x32xf32>
    %cst_40 = arith.constant dense<0.000000e+00> : vector<32x32xf32>
    %94 = tpu.matmul %88, %93, %cst_40 {dimension_numbers = #tpu.dot_dimension_numbers<[1], [0], [0], [1], [0, 0, 1, 1], [], []>} : vector<32x96xf32>, vector<96x32xf32>, vector<32x32xf32> -> vector<32x32xf32>
    %95 = vector.extract_strided_slice %44 {offsets = [0, 0], sizes = [32, 32], strides = [1, 1]} : vector<32x128xf32> to vector<32x32xf32>
    %96 = arith.addf %94, %95 : vector<32x32xf32>
    %cst_41 = arith.constant 0.000000e+00 : f32
    %97 = vector.broadcast %cst_41 : f32 to vector<32x32xf32>
    %98 = arith.subf %97, %92 : vector<32x32xf32>
    %99 = math.exp %98 : vector<32x32xf32>
    %cst_42 = arith.constant 1.000000e+00 : f32
    %100 = vector.broadcast %cst_42 : f32 to vector<32x32xf32>
    %101 = arith.addf %100, %99 : vector<32x32xf32>
    %cst_43 = arith.constant 1.000000e+00 : f32
    %102 = vector.broadcast %cst_43 : f32 to vector<32x32xf32>
    %103 = arith.divf %102, %101 : vector<32x32xf32>
    %104 = math.tanh %96 : vector<32x32xf32>
    %105 = arith.mulf %103, %104 : vector<32x32xf32>
    %c464 = arith.constant 464 : index
    %c0_44 = arith.constant 0 : index
    %106 = vector.load %arg4[%c464, %c0_44] : memref<1296x32xf32, #tpu.memory_space<vmem>>, vector<32x32xf32>
    %cst_45 = arith.constant dense<0.000000e+00> : vector<32x32xf32>
    %107 = tpu.matmul %105, %106, %cst_45 {dimension_numbers = #tpu.dot_dimension_numbers<[1], [0], [0], [1], [0, 0, 1, 1], [], []>} : vector<32x32xf32>, vector<32x32xf32>, vector<32x32xf32> -> vector<32x32xf32>
    %108 = vector.extract_strided_slice %69 {offsets = [0, 0], sizes = [1, 32], strides = [1, 1]} : vector<4x32xf32> to vector<1x32xf32>
    %109 = vector.broadcast %108 : vector<1x32xf32> to vector<32x32xf32>
    %110 = arith.addf %107, %109 : vector<32x32xf32>
    %c496 = arith.constant 496 : index
    %c0_46 = arith.constant 0 : index
    %111 = vector.load %arg4[%c496, %c0_46] : memref<1296x32xf32, #tpu.memory_space<vmem>>, vector<32x32xf32>
    %cst_47 = arith.constant dense<0.000000e+00> : vector<32x32xf32>
    %112 = tpu.matmul %105, %111, %cst_47 {dimension_numbers = #tpu.dot_dimension_numbers<[1], [0], [0], [1], [0, 0, 1, 1], [], []>} : vector<32x32xf32>, vector<32x32xf32>, vector<32x32xf32> -> vector<32x32xf32>
    %113 = vector.extract_strided_slice %70 {offsets = [0, 0], sizes = [1, 32], strides = [1, 1]} : vector<4x32xf32> to vector<1x32xf32>
    %114 = vector.broadcast %113 : vector<1x32xf32> to vector<32x32xf32>
    %115 = arith.addf %112, %114 : vector<32x32xf32>
    %116 = arith.addf %51, %110 : vector<32x32xf32>
    %cst_48 = arith.constant 0.707106769 : f32
    %117 = vector.broadcast %cst_48 : f32 to vector<32x32xf32>
    %118 = arith.mulf %116, %117 : vector<32x32xf32>
    %119 = arith.addf %71, %115 : vector<32x32xf32>
    %120 = vector.extract_strided_slice %34 {offsets = [0, 32], sizes = [32, 32], strides = [1, 1]} : vector<32x128xf32> to vector<32x32xf32>
    %121 = arith.addf %118, %120 : vector<32x32xf32>
    %c2_i32 = arith.constant 2 : i32
    %122 = vector.broadcast %c2_i32 : i32 to vector<32x32xi32>
    %123 = arith.cmpi sge, %68, %122 : vector<32x32xi32>
    %124 = vector.extract_strided_slice %121 {offsets = [30, 0], sizes = [2, 32], strides = [1, 1]} : vector<32x32xf32> to vector<2x32xf32>
    %125 = vector.extract_strided_slice %121 {offsets = [0, 0], sizes = [30, 32], strides = [1, 1]} : vector<32x32xf32> to vector<30x32xf32>
    %126 = tpu.concatenate %124, %125 in 0 : vector<2x32xf32>, vector<30x32xf32> -> vector<32x32xf32>
    %cst_49 = arith.constant 0.000000e+00 : f32
    %127 = vector.broadcast %cst_49 : f32 to vector<32x32xf32>
    %128 = arith.select %123, %126, %127 : vector<32x32xi1>, vector<32x32xf32>
    %c14_i32 = arith.constant 14 : i32
    %129 = vector.broadcast %c14_i32 : i32 to vector<32x32xi32>
    %130 = arith.cmpi slt, %68, %129 : vector<32x32xi32>
    %131 = vector.extract_strided_slice %121 {offsets = [2, 0], sizes = [30, 32], strides = [1, 1]} : vector<32x32xf32> to vector<30x32xf32>
    %132 = vector.extract_strided_slice %121 {offsets = [0, 0], sizes = [2, 32], strides = [1, 1]} : vector<32x32xf32> to vector<2x32xf32>
    %133 = tpu.concatenate %131, %132 in 0 : vector<30x32xf32>, vector<2x32xf32> -> vector<32x32xf32>
    %cst_50 = arith.constant 0.000000e+00 : f32
    %134 = vector.broadcast %cst_50 : f32 to vector<32x32xf32>
    %135 = arith.select %130, %133, %134 : vector<32x32xi1>, vector<32x32xf32>
    %136 = tpu.concatenate %128, %121, %135 in 1 : vector<32x32xf32>, vector<32x32xf32>, vector<32x32xf32> -> vector<32x96xf32>
    %c528 = arith.constant 528 : index
    %c0_51 = arith.constant 0 : index
    %137 = vector.load %arg4[%c528, %c0_51] : memref<1296x32xf32, #tpu.memory_space<vmem>>, vector<96x32xf32>
    %cst_52 = arith.constant dense<0.000000e+00> : vector<32x32xf32>
    %138 = tpu.matmul %136, %137, %cst_52 {dimension_numbers = #tpu.dot_dimension_numbers<[1], [0], [0], [1], [0, 0, 1, 1], [], []>} : vector<32x96xf32>, vector<96x32xf32>, vector<32x32xf32> -> vector<32x32xf32>
    %139 = vector.extract_strided_slice %39 {offsets = [0, 32], sizes = [32, 32], strides = [1, 1]} : vector<32x128xf32> to vector<32x32xf32>
    %140 = arith.addf %138, %139 : vector<32x32xf32>
    %c624 = arith.constant 624 : index
    %c0_53 = arith.constant 0 : index
    %141 = vector.load %arg4[%c624, %c0_53] : memref<1296x32xf32, #tpu.memory_space<vmem>>, vector<96x32xf32>
    %cst_54 = arith.constant dense<0.000000e+00> : vector<32x32xf32>
    %142 = tpu.matmul %136, %141, %cst_54 {dimension_numbers = #tpu.dot_dimension_numbers<[1], [0], [0], [1], [0, 0, 1, 1], [], []>} : vector<32x96xf32>, vector<96x32xf32>, vector<32x32xf32> -> vector<32x32xf32>
    %143 = vector.extract_strided_slice %44 {offsets = [0, 32], sizes = [32, 32], strides = [1, 1]} : vector<32x128xf32> to vector<32x32xf32>
    %144 = arith.addf %142, %143 : vector<32x32xf32>
    %cst_55 = arith.constant 0.000000e+00 : f32
    %145 = vector.broadcast %cst_55 : f32 to vector<32x32xf32>
    %146 = arith.subf %145, %140 : vector<32x32xf32>
    %147 = math.exp %146 : vector<32x32xf32>
    %cst_56 = arith.constant 1.000000e+00 : f32
    %148 = vector.broadcast %cst_56 : f32 to vector<32x32xf32>
    %149 = arith.addf %148, %147 : vector<32x32xf32>
    %cst_57 = arith.constant 1.000000e+00 : f32
    %150 = vector.broadcast %cst_57 : f32 to vector<32x32xf32>
    %151 = arith.divf %150, %149 : vector<32x32xf32>
    %152 = math.tanh %144 : vector<32x32xf32>
    %153 = arith.mulf %151, %152 : vector<32x32xf32>
    %c720 = arith.constant 720 : index
    %c0_58 = arith.constant 0 : index
    %154 = vector.load %arg4[%c720, %c0_58] : memref<1296x32xf32, #tpu.memory_space<vmem>>, vector<32x32xf32>
    %cst_59 = arith.constant dense<0.000000e+00> : vector<32x32xf32>
    %155 = tpu.matmul %153, %154, %cst_59 {dimension_numbers = #tpu.dot_dimension_numbers<[1], [0], [0], [1], [0, 0, 1, 1], [], []>} : vector<32x32xf32>, vector<32x32xf32>, vector<32x32xf32> -> vector<32x32xf32>
    %156 = vector.extract_strided_slice %69 {offsets = [1, 0], sizes = [1, 32], strides = [1, 1]} : vector<4x32xf32> to vector<1x32xf32>
    %157 = vector.broadcast %156 : vector<1x32xf32> to vector<32x32xf32>
    %158 = arith.addf %155, %157 : vector<32x32xf32>
    %c752 = arith.constant 752 : index
    %c0_60 = arith.constant 0 : index
    %159 = vector.load %arg4[%c752, %c0_60] : memref<1296x32xf32, #tpu.memory_space<vmem>>, vector<32x32xf32>
    %cst_61 = arith.constant dense<0.000000e+00> : vector<32x32xf32>
    %160 = tpu.matmul %153, %159, %cst_61 {dimension_numbers = #tpu.dot_dimension_numbers<[1], [0], [0], [1], [0, 0, 1, 1], [], []>} : vector<32x32xf32>, vector<32x32xf32>, vector<32x32xf32> -> vector<32x32xf32>
    %161 = vector.extract_strided_slice %70 {offsets = [1, 0], sizes = [1, 32], strides = [1, 1]} : vector<4x32xf32> to vector<1x32xf32>
    %162 = vector.broadcast %161 : vector<1x32xf32> to vector<32x32xf32>
    %163 = arith.addf %160, %162 : vector<32x32xf32>
    %164 = arith.addf %118, %158 : vector<32x32xf32>
    %cst_62 = arith.constant 0.707106769 : f32
    %165 = vector.broadcast %cst_62 : f32 to vector<32x32xf32>
    %166 = arith.mulf %164, %165 : vector<32x32xf32>
    %167 = arith.addf %119, %163 : vector<32x32xf32>
    %168 = vector.extract_strided_slice %34 {offsets = [0, 64], sizes = [32, 32], strides = [1, 1]} : vector<32x128xf32> to vector<32x32xf32>
    %169 = arith.addf %166, %168 : vector<32x32xf32>
    %c1_i32_63 = arith.constant 1 : i32
    %170 = vector.broadcast %c1_i32_63 : i32 to vector<32x32xi32>
    %171 = arith.cmpi sge, %68, %170 : vector<32x32xi32>
    %172 = vector.extract_strided_slice %169 {offsets = [31, 0], sizes = [1, 32], strides = [1, 1]} : vector<32x32xf32> to vector<1x32xf32>
    %173 = vector.extract_strided_slice %169 {offsets = [0, 0], sizes = [31, 32], strides = [1, 1]} : vector<32x32xf32> to vector<31x32xf32>
    %174 = tpu.concatenate %172, %173 in 0 : vector<1x32xf32>, vector<31x32xf32> -> vector<32x32xf32>
    %cst_64 = arith.constant 0.000000e+00 : f32
    %175 = vector.broadcast %cst_64 : f32 to vector<32x32xf32>
    %176 = arith.select %171, %174, %175 : vector<32x32xi1>, vector<32x32xf32>
    %c15_i32_65 = arith.constant 15 : i32
    %177 = vector.broadcast %c15_i32_65 : i32 to vector<32x32xi32>
    %178 = arith.cmpi slt, %68, %177 : vector<32x32xi32>
    %179 = vector.extract_strided_slice %169 {offsets = [1, 0], sizes = [31, 32], strides = [1, 1]} : vector<32x32xf32> to vector<31x32xf32>
    %180 = vector.extract_strided_slice %169 {offsets = [0, 0], sizes = [1, 32], strides = [1, 1]} : vector<32x32xf32> to vector<1x32xf32>
    %181 = tpu.concatenate %179, %180 in 0 : vector<31x32xf32>, vector<1x32xf32> -> vector<32x32xf32>
    %cst_66 = arith.constant 0.000000e+00 : f32
    %182 = vector.broadcast %cst_66 : f32 to vector<32x32xf32>
    %183 = arith.select %178, %181, %182 : vector<32x32xi1>, vector<32x32xf32>
    %184 = tpu.concatenate %176, %169, %183 in 1 : vector<32x32xf32>, vector<32x32xf32>, vector<32x32xf32> -> vector<32x96xf32>
    %c784 = arith.constant 784 : index
    %c0_67 = arith.constant 0 : index
    %185 = vector.load %arg4[%c784, %c0_67] : memref<1296x32xf32, #tpu.memory_space<vmem>>, vector<96x32xf32>
    %cst_68 = arith.constant dense<0.000000e+00> : vector<32x32xf32>
    %186 = tpu.matmul %184, %185, %cst_68 {dimension_numbers = #tpu.dot_dimension_numbers<[1], [0], [0], [1], [0, 0, 1, 1], [], []>} : vector<32x96xf32>, vector<96x32xf32>, vector<32x32xf32> -> vector<32x32xf32>
    %187 = vector.extract_strided_slice %39 {offsets = [0, 64], sizes = [32, 32], strides = [1, 1]} : vector<32x128xf32> to vector<32x32xf32>
    %188 = arith.addf %186, %187 : vector<32x32xf32>
    %c880 = arith.constant 880 : index
    %c0_69 = arith.constant 0 : index
    %189 = vector.load %arg4[%c880, %c0_69] : memref<1296x32xf32, #tpu.memory_space<vmem>>, vector<96x32xf32>
    %cst_70 = arith.constant dense<0.000000e+00> : vector<32x32xf32>
    %190 = tpu.matmul %184, %189, %cst_70 {dimension_numbers = #tpu.dot_dimension_numbers<[1], [0], [0], [1], [0, 0, 1, 1], [], []>} : vector<32x96xf32>, vector<96x32xf32>, vector<32x32xf32> -> vector<32x32xf32>
    %191 = vector.extract_strided_slice %44 {offsets = [0, 64], sizes = [32, 32], strides = [1, 1]} : vector<32x128xf32> to vector<32x32xf32>
    %192 = arith.addf %190, %191 : vector<32x32xf32>
    %cst_71 = arith.constant 0.000000e+00 : f32
    %193 = vector.broadcast %cst_71 : f32 to vector<32x32xf32>
    %194 = arith.subf %193, %188 : vector<32x32xf32>
    %195 = math.exp %194 : vector<32x32xf32>
    %cst_72 = arith.constant 1.000000e+00 : f32
    %196 = vector.broadcast %cst_72 : f32 to vector<32x32xf32>
    %197 = arith.addf %196, %195 : vector<32x32xf32>
    %cst_73 = arith.constant 1.000000e+00 : f32
    %198 = vector.broadcast %cst_73 : f32 to vector<32x32xf32>
    %199 = arith.divf %198, %197 : vector<32x32xf32>
    %200 = math.tanh %192 : vector<32x32xf32>
    %201 = arith.mulf %199, %200 : vector<32x32xf32>
    %c976 = arith.constant 976 : index
    %c0_74 = arith.constant 0 : index
    %202 = vector.load %arg4[%c976, %c0_74] : memref<1296x32xf32, #tpu.memory_space<vmem>>, vector<32x32xf32>
    %cst_75 = arith.constant dense<0.000000e+00> : vector<32x32xf32>
    %203 = tpu.matmul %201, %202, %cst_75 {dimension_numbers = #tpu.dot_dimension_numbers<[1], [0], [0], [1], [0, 0, 1, 1], [], []>} : vector<32x32xf32>, vector<32x32xf32>, vector<32x32xf32> -> vector<32x32xf32>
    %204 = vector.extract_strided_slice %69 {offsets = [2, 0], sizes = [1, 32], strides = [1, 1]} : vector<4x32xf32> to vector<1x32xf32>
    %205 = vector.broadcast %204 : vector<1x32xf32> to vector<32x32xf32>
    %206 = arith.addf %203, %205 : vector<32x32xf32>
    %c1008 = arith.constant 1008 : index
    %c0_76 = arith.constant 0 : index
    %207 = vector.load %arg4[%c1008, %c0_76] : memref<1296x32xf32, #tpu.memory_space<vmem>>, vector<32x32xf32>
    %cst_77 = arith.constant dense<0.000000e+00> : vector<32x32xf32>
    %208 = tpu.matmul %201, %207, %cst_77 {dimension_numbers = #tpu.dot_dimension_numbers<[1], [0], [0], [1], [0, 0, 1, 1], [], []>} : vector<32x32xf32>, vector<32x32xf32>, vector<32x32xf32> -> vector<32x32xf32>
    %209 = vector.extract_strided_slice %70 {offsets = [2, 0], sizes = [1, 32], strides = [1, 1]} : vector<4x32xf32> to vector<1x32xf32>
    %210 = vector.broadcast %209 : vector<1x32xf32> to vector<32x32xf32>
    %211 = arith.addf %208, %210 : vector<32x32xf32>
    %212 = arith.addf %166, %206 : vector<32x32xf32>
    %cst_78 = arith.constant 0.707106769 : f32
    %213 = vector.broadcast %cst_78 : f32 to vector<32x32xf32>
    %214 = arith.mulf %212, %213 : vector<32x32xf32>
    %215 = arith.addf %167, %211 : vector<32x32xf32>
    %216 = vector.extract_strided_slice %34 {offsets = [0, 96], sizes = [32, 32], strides = [1, 1]} : vector<32x128xf32> to vector<32x32xf32>
    %217 = arith.addf %214, %216 : vector<32x32xf32>
    %c2_i32_79 = arith.constant 2 : i32
    %218 = vector.broadcast %c2_i32_79 : i32 to vector<32x32xi32>
    %219 = arith.cmpi sge, %68, %218 : vector<32x32xi32>
    %220 = vector.extract_strided_slice %217 {offsets = [30, 0], sizes = [2, 32], strides = [1, 1]} : vector<32x32xf32> to vector<2x32xf32>
    %221 = vector.extract_strided_slice %217 {offsets = [0, 0], sizes = [30, 32], strides = [1, 1]} : vector<32x32xf32> to vector<30x32xf32>
    %222 = tpu.concatenate %220, %221 in 0 : vector<2x32xf32>, vector<30x32xf32> -> vector<32x32xf32>
    %cst_80 = arith.constant 0.000000e+00 : f32
    %223 = vector.broadcast %cst_80 : f32 to vector<32x32xf32>
    %224 = arith.select %219, %222, %223 : vector<32x32xi1>, vector<32x32xf32>
    %c14_i32_81 = arith.constant 14 : i32
    %225 = vector.broadcast %c14_i32_81 : i32 to vector<32x32xi32>
    %226 = arith.cmpi slt, %68, %225 : vector<32x32xi32>
    %227 = vector.extract_strided_slice %217 {offsets = [2, 0], sizes = [30, 32], strides = [1, 1]} : vector<32x32xf32> to vector<30x32xf32>
    %228 = vector.extract_strided_slice %217 {offsets = [0, 0], sizes = [2, 32], strides = [1, 1]} : vector<32x32xf32> to vector<2x32xf32>
    %229 = tpu.concatenate %227, %228 in 0 : vector<30x32xf32>, vector<2x32xf32> -> vector<32x32xf32>
    %cst_82 = arith.constant 0.000000e+00 : f32
    %230 = vector.broadcast %cst_82 : f32 to vector<32x32xf32>
    %231 = arith.select %226, %229, %230 : vector<32x32xi1>, vector<32x32xf32>
    %232 = tpu.concatenate %224, %217, %231 in 1 : vector<32x32xf32>, vector<32x32xf32>, vector<32x32xf32> -> vector<32x96xf32>
    %c1040 = arith.constant 1040 : index
    %c0_83 = arith.constant 0 : index
    %233 = vector.load %arg4[%c1040, %c0_83] : memref<1296x32xf32, #tpu.memory_space<vmem>>, vector<96x32xf32>
    %cst_84 = arith.constant dense<0.000000e+00> : vector<32x32xf32>
    %234 = tpu.matmul %232, %233, %cst_84 {dimension_numbers = #tpu.dot_dimension_numbers<[1], [0], [0], [1], [0, 0, 1, 1], [], []>} : vector<32x96xf32>, vector<96x32xf32>, vector<32x32xf32> -> vector<32x32xf32>
    %235 = vector.extract_strided_slice %39 {offsets = [0, 96], sizes = [32, 32], strides = [1, 1]} : vector<32x128xf32> to vector<32x32xf32>
    %236 = arith.addf %234, %235 : vector<32x32xf32>
    %c1136 = arith.constant 1136 : index
    %c0_85 = arith.constant 0 : index
    %237 = vector.load %arg4[%c1136, %c0_85] : memref<1296x32xf32, #tpu.memory_space<vmem>>, vector<96x32xf32>
    %cst_86 = arith.constant dense<0.000000e+00> : vector<32x32xf32>
    %238 = tpu.matmul %232, %237, %cst_86 {dimension_numbers = #tpu.dot_dimension_numbers<[1], [0], [0], [1], [0, 0, 1, 1], [], []>} : vector<32x96xf32>, vector<96x32xf32>, vector<32x32xf32> -> vector<32x32xf32>
    %239 = vector.extract_strided_slice %44 {offsets = [0, 96], sizes = [32, 32], strides = [1, 1]} : vector<32x128xf32> to vector<32x32xf32>
    %240 = arith.addf %238, %239 : vector<32x32xf32>
    %cst_87 = arith.constant 0.000000e+00 : f32
    %241 = vector.broadcast %cst_87 : f32 to vector<32x32xf32>
    %242 = arith.subf %241, %236 : vector<32x32xf32>
    %243 = math.exp %242 : vector<32x32xf32>
    %cst_88 = arith.constant 1.000000e+00 : f32
    %244 = vector.broadcast %cst_88 : f32 to vector<32x32xf32>
    %245 = arith.addf %244, %243 : vector<32x32xf32>
    %cst_89 = arith.constant 1.000000e+00 : f32
    %246 = vector.broadcast %cst_89 : f32 to vector<32x32xf32>
    %247 = arith.divf %246, %245 : vector<32x32xf32>
    %248 = math.tanh %240 : vector<32x32xf32>
    %249 = arith.mulf %247, %248 : vector<32x32xf32>
    %c1264 = arith.constant 1264 : index
    %c0_90 = arith.constant 0 : index
    %250 = vector.load %arg4[%c1264, %c0_90] : memref<1296x32xf32, #tpu.memory_space<vmem>>, vector<32x32xf32>
    %cst_91 = arith.constant dense<0.000000e+00> : vector<32x32xf32>
    %251 = tpu.matmul %249, %250, %cst_91 {dimension_numbers = #tpu.dot_dimension_numbers<[1], [0], [0], [1], [0, 0, 1, 1], [], []>} : vector<32x32xf32>, vector<32x32xf32>, vector<32x32xf32> -> vector<32x32xf32>
    %252 = vector.extract_strided_slice %70 {offsets = [3, 0], sizes = [1, 32], strides = [1, 1]} : vector<4x32xf32> to vector<1x32xf32>
    %253 = vector.broadcast %252 : vector<1x32xf32> to vector<32x32xf32>
    %254 = arith.addf %251, %253 : vector<32x32xf32>
    %255 = arith.addf %215, %254 : vector<32x32xf32>
    %cst_92 = arith.constant 5.000000e-01 : f32
    %256 = vector.broadcast %cst_92 : f32 to vector<32x32xf32>
    %257 = arith.mulf %255, %256 : vector<32x32xf32>
    %c176 = arith.constant 176 : index
    %c0_93 = arith.constant 0 : index
    %258 = vector.load %arg4[%c176, %c0_93] : memref<1296x32xf32, #tpu.memory_space<vmem>>, vector<32x32xf32>
    %cst_94 = arith.constant dense<0.000000e+00> : vector<32x32xf32>
    %259 = tpu.matmul %257, %258, %cst_94 {dimension_numbers = #tpu.dot_dimension_numbers<[1], [0], [0], [1], [0, 0, 1, 1], [], []>} : vector<32x32xf32>, vector<32x32xf32>, vector<32x32xf32> -> vector<32x32xf32>
    %c208 = arith.constant 208 : index
    %c0_95 = arith.constant 0 : index
    %260 = vector.load %arg4[%c208, %c0_95] : memref<1296x32xf32, #tpu.memory_space<vmem>>, vector<1x32xf32>
    %261 = vector.broadcast %260 : vector<1x32xf32> to vector<32x32xf32>
    %262 = arith.addf %259, %261 : vector<32x32xf32>
    %cst_96 = arith.constant 0.000000e+00 : f32
    %263 = vector.broadcast %cst_96 : f32 to vector<32x32xf32>
    %264 = arith.maximumf %262, %263 : vector<32x32xf32>
    %c216 = arith.constant 216 : index
    %c0_97 = arith.constant 0 : index
    %265 = vector.load %arg4[%c216, %c0_97] : memref<1296x32xf32, #tpu.memory_space<vmem>>, vector<32x32xf32>
    %cst_98 = arith.constant dense<0.000000e+00> : vector<32x32xf32>
    %266 = tpu.matmul %264, %265, %cst_98 {dimension_numbers = #tpu.dot_dimension_numbers<[1], [0], [0], [1], [0, 0, 1, 1], [], []>} : vector<32x32xf32>, vector<32x32xf32>, vector<32x32xf32> -> vector<32x32xf32>
    %c248 = arith.constant 248 : index
    %c0_99 = arith.constant 0 : index
    %267 = vector.load %arg4[%c248, %c0_99] : memref<1296x32xf32, #tpu.memory_space<vmem>>, vector<1x32xf32>
    %268 = vector.broadcast %267 : vector<1x32xf32> to vector<32x32xf32>
    %269 = arith.addf %266, %268 : vector<32x32xf32>
    %c0_100 = arith.constant 0 : index
    %c0_101 = arith.constant 0 : index
    %270 = vector.load %arg5[%c0_100, %c0_101] : memref<32x32xf32, #tpu.memory_space<vmem>>, vector<32x32xf32>
    tpu.vector_store %arg5[%c0_100, %c0_101], %269 {strides = array<i32>} : memref<32x32xf32, #tpu.memory_space<vmem>>, vector<32x32xf32>,
    return
  }
}

</mosaic_0001>

<bundles_post_ra>
// kernel: tpu_custom_call.1
= control target key start
LH: loop header
LB: loop body
LE: loop exit
PB: predicated region body
PF: predicated region fallthrough
CT: control target
= control target key end

     0   :  { %v4334_v3 = vmov 0.0|0.0   ;;  %vm4335_vm0 = vmmov 0   ;;  %v4336_v6 = vmov 0.0   ;;  %s5434_s0 = inlined_call_operand.vmem [shape: f32[32,32], index: 0, kind: input, shape index: {}]   ;;  %s5435_s1 = inlined_call_operand.vmem [shape: f32[32,32], index: 1, kind: input, shape index: {}]   ;;  %s5436_s2 = inlined_call_operand.vmem [shape: f32[2,32], index: 2, kind: input, shape index: {}]   ;;  %s5437_s3 = inlined_call_operand.vmem [shape: f32[160,128], index: 3, kind: input, shape index: {}]   ;;  %s5438_s4 = inlined_call_operand.vmem [shape: f32[1296,32], index: 4, kind: input, shape index: {}]   ;;  %s5439_s5 = inlined_call_operand.hbm [shape: f32[32,32], index: 5, kind: output, shape index: {}]  }
   0x1   :  { %v30_v0 = vld [vmem:[%s5437_s3] sm:$0xff]  ;;  %v31_v1 = vld [vmem:[%s5437_s3 + $0x8] sm:$0xff]  ;;  %v32_v2 = vld [vmem:[%s5437_s3 + $0x10] sm:$0xff]  ;;  %3847 = vmatprep.subr.bf16.mxu0 %v4334_v3  ;;  %3390 = vmatprep.mubr.msk.f32.mxu0 %vm4335_vm0, %v4336_v6 }
   0x2   :  { %v3848_v4 = vpack.c.bf16 %v31_v1, %v30_v0  ;;  %v33_v5 = vld [vmem:[%s5437_s3 + $0x18] sm:$0xff]  ;;  %3853 = vmatprep.subr.bf16.mxu1 %v4334_v3  ;;  %3425 = vmatprep.mubr.msk.f32.mxu1 %vm4335_vm0, %v4336_v6 }
   0x3   :  { %10 = vsyncpa [#allocation3], 0  ;;  %v3851_v7 = vpack.c.bf16 %v33_v5, %v32_v2  ;;  %v29_v8 = vld [vmem:[%s5436_s2] sm:$0x3]  ;;  %vm39_vm1 = vcmask 261120   ;;  %v130_v9 = vld [vmem:[%s5438_s4 + $0x28] sm:$0xff] }
   0x4   :  { %3849 = vmatpush3.bf16.msra.mxu0 %v3848_v4  ;;  %v131_v10 = vld [vmem:[%s5438_s4 + $0x30] sm:$0xff]  ;;  %v132_v12 = vld [vmem:[%s5438_s4 + $0x38] sm:$0xff]  ;;  %v133_v13 = vld [vmem:[%s5438_s4 + $0x40] sm:$0xff]  ;;  %vm712_vm3 = vcmask 1046528   ;;  %vm692_vm4 = vcmask 1040384   ;;  %s4337_s29 = smov 32  }
   0x5   :  { %3850 = vmatprep.subr.bf16.mxu0 %v4334_v3  ;;  %v3854_v11 = vpack.c.bf16 %v131_v10, %v130_v9  ;;  %v3857_v14 = vpack.c.bf16 %v133_v13, %v132_v12  ;;  %v134_v15 = vld [vmem:[%s5438_s4 + $0x48] sm:$0xff]  ;;  %v135_v16 = vld [vmem:[%s5438_s4 + $0x50] sm:$0xff]  ;;  %v136_v18 = vld [vmem:[%s5438_s4 + $0x58] sm:$0xff]  ;;  %s4338_s30 = smov 64   ;;  %s4339_s6 = smov 96   ;;  %vm762_vm8 = vcmask 523264  }
   0x6   :  { %v3860_v17 = vpack.c.bf16 %v135_v16, %v134_v15  ;;  %v137_v19 = vld [vmem:[%s5438_s4 + $0x60] sm:$0xff]  ;;  %v138_v21 = vld [vmem:[%s5438_s4 + $0x68] sm:$0xff]  ;;  %v139_v22 = vld [vmem:[%s5438_s4 + $0x70] sm:$0xff]  ;;  %vm779_vm9 = vcmask 785408   ;;  %vm1256_vm11 = vcmask 1045504   ;;  %vm1236_vm12 = vcmask 1041408  }
   0x7   :  { %3855 = vmatpush3.bf16.msra.mxu1 %v3854_v11  ;;  %v3863_v20 = vpack.c.bf16 %v137_v19, %v136_v18  ;;  %v3866_v23 = vpack.c.bf16 %v139_v22, %v138_v21  ;;  %v140_v24 = vld [vmem:[%s5438_s4 + $0x78] sm:$0xff]  ;;  %v141_v25 = vld [vmem:[%s5438_s4 + $0x80] sm:$0xff]  ;;  %v142_v27 = vld [vmem:[%s5438_s4 + $0x88] sm:$0xff] }
   0x8   :  { %3852 = vmatpush3.bf16.msra.mxu0 %v3851_v7  ;;  %3856 = vmatprep.subr.bf16.mxu1 %v4334_v3  ;;  %v3869_v26 = vpack.c.bf16 %v141_v25, %v140_v24  ;;  %v143_v28 = vld [vmem:[%s5438_s4 + $0x90] sm:$0xff]  ;;  %v144_v30 = vld [vmem:[%s5438_s4 + $0x98] sm:$0xff]  ;;  %v145_v31 = vld [vmem:[%s5438_s4 + $0xa0] sm:$0xff] }
   0x9   :  { %3877 = vmatprep.subr.bf16.mxu0 %v4334_v3  ;;  %v3872_v29 = vpack.c.bf16 %v143_v28, %v142_v27  ;;  %v3875_v32 = vpack.c.bf16 %v145_v31, %v144_v30  ;;  %v221_v33 = vld [vmem:[%s5437_s3 + $0x20] sm:$0xff]  ;;  %v222_v34 = vld [vmem:[%s5437_s3 + $0x28] sm:$0xff]  ;;  %v223_v35 = vld [vmem:[%s5437_s3 + $0x30] sm:$0xff] }
   0xa   :  { %v3878_v36 = vpack.c.bf16 %v222_v34, %v221_v33  ;;  %v224_v37 = vld [vmem:[%s5437_s3 + $0x38] sm:$0xff]  ;;  %v3041_v39 = vld [vmem:[%s5437_s3 + $0x80] ss:$0 sm:$0xff]  ;;  %v314_v60 = vld [vmem:[%s5437_s3 + $0x48] sm:$0xff] }
   0xb   :  { %3391 = vmatmul.mubr.msk.f32.vlgmr.msra.gmra.mrb[0].mxu0 %vm39_vm1, %v29_v8  ;;  %3858 = vmatpush3.bf16.msra.mxu1 %v3857_v14  ;;  %v3881_v38 = vpack.c.bf16 %v224_v37, %v223_v35  ;;  %v313_v59 = vld [vmem:[%s5437_s3 + $0x40] sm:$0xff]  ;;  %v3043_v62 = vld [vmem:[%s5438_s4 + $0xa8] ss:$0 sm:$0xff]  ;;  %v315_v63 = vld [vmem:[%s5437_s3 + $0x50] sm:$0xff] }
   0xc   :  { %3436 = vmatprep.mubr.msk.f32.mxu0 %vm4335_vm0, %v4336_v6  ;;  %3859 = vmatprep.subr.bf16.mxu1 %v4334_v3  ;;  %v3883_v61 = vpack.c.bf16 %v314_v60, %v313_v59  ;;  %v316_v0 = vld [vmem:[%s5437_s3 + $0x58] sm:$0xff]  ;;  %v25_v5 = vld [vmem:[%s5435_s1] sm:$0xff]  ;;  %v420_v7 = vld [vmem:[%s5437_s3 + $0x68] sm:$0xff] }
   0xd   :  { %3879 = vmatpush3.bf16.msra.mxu0 %v3878_v36  ;;  %v3887_v4 = vpack.c.bf16 %v316_v0, %v315_v63  ;;  %v419_v6 = vld [vmem:[%s5437_s3 + $0x60] sm:$0xff]  ;;  %v421_v9 = vld [vmem:[%s5437_s3 + $0x70] sm:$0xff]  ;;  %v422_v10 = vld [vmem:[%s5437_s3 + $0x78] sm:$0xff] }
   0xe   :  { %3880 = vmatprep.subr.bf16.mxu0 %v4334_v3  ;;  %v3891_v8 = vpack.c.bf16 %v420_v7, %v419_v6  ;;  %v26_v11 = vld [vmem:[%s5435_s1 + $0x8] sm:$0xff]  ;;  %v27_v12 = vld [vmem:[%s5435_s1 + $0x10] sm:$0xff]  ;;  %v3895_v13 = vpack.c.bf16 %v422_v10, %v421_v9  ;;  %v513_v14 = vld [vmem:[%s5438_s4] sm:$0xff] }
   0xf   :  { %3861 = vmatpush3.bf16.msra.mxu1 %v3860_v17  ;;  %v514_v15 = vld [vmem:[%s5438_s4 + $0x8] sm:$0xff]  ;;  %v28_v16 = vld [vmem:[%s5435_s1 + $0x18] sm:$0xff]  ;;  %v515_v18 = vld [vmem:[%s5438_s4 + $0x10] sm:$0xff] }
  0x10   :  { %3862 = vmatprep.subr.bf16.mxu1 %v4334_v3  ;;  %v3899_v17 = vpack.c.bf16 %v514_v15, %v513_v14  ;;  %v516_v19 = vld [vmem:[%s5438_s4 + $0x18] sm:$0xff]  ;;  %v21_v21 = vld [vmem:[%s5434_s0] sm:$0xff]  ;;  %v22_v22 = vld [vmem:[%s5434_s0 + $0x8] sm:$0xff] }
  0x11   :  { %3882 = vmatpush3.bf16.msra.mxu0 %v3881_v38  ;;  %v24_v24 = vld [vmem:[%s5434_s0 + $0x18] sm:$0xff]  ;;  %v767_v25 = vld [vmem:[%s5438_s4 + $0x110] sm:$0xff]  ;;  %v769_v30 = vld [vmem:[%s5438_s4 + $0x120] sm:$0xff] }
  0x12   :  { %3884 = vmatprep.subr.bf16.mxu0 %v3883_v61  ;;  %v877_v27 = vld [vmem:[%s5438_s4 + $0x170] sm:$0xff]  ;;  %v770_v31 = vld [vmem:[%s5438_s4 + $0x128] sm:$0xff]  ;;  %v879_v34 = vld [vmem:[%s5438_s4 + $0x180] sm:$0xff] }
  0x13   :  { %3864 = vmatpush3.bf16.msra.mxu1 %v3863_v20  ;;  %v3903_v20 = vpack.c.bf16 %v516_v19, %v515_v18  ;;  %v3911_v33 = vpack.c.bf16 %v770_v31, %v769_v30  ;;  %v880_v35 = vld [vmem:[%s5438_s4 + $0x188] sm:$0xff]  ;;  %v771_v36 = vld [vmem:[%s5438_s4 + $0x130] sm:$0xff]  ;;  %v772_v38 = vld [vmem:[%s5438_s4 + $0x138] sm:$0xff] }
  0x14   :  { %3865 = vmatprep.subr.bf16.mxu1 %v4334_v3  ;;  %v3935_v37 = vpack.c.bf16 %v880_v35, %v879_v34  ;;  %v885_v63 = vld [vmem:[%s5438_s4 + $0x1b0] sm:$0xff]  ;;  %v777_v10 = vld [vmem:[%s5438_s4 + $0x160] sm:$0xff]  ;;  %v888_v15 = vld [vmem:[%s5438_s4 + $0x1c8] sm:$0xff] }
  0x17   :  { %3867 = vmatpush3.bf16.msra.mxu1 %v3866_v23  ;;  %v23_v23 = vld [vmem:[%s5434_s0 + $0x10] sm:$0xff] }
  0x18   :  { %3868 = vmatprep.subr.bf16.mxu1 %v4334_v3 }
  0x1b   :  { %3870 = vmatpush3.bf16.msra.mxu1 %v3869_v26  ;;  %v768_v26 = vld [vmem:[%s5438_s4 + $0x118] sm:$0xff] }
  0x1c   :  { %3871 = vmatprep.subr.bf16.mxu1 %v4334_v3  ;;  %v3907_v28 = vpack.c.bf16 %v768_v26, %v767_v25 }
  0x1f   :  { %3873 = vmatpush3.bf16.msra.mxu1 %v3872_v29  ;;  %v878_v29 = vld [vmem:[%s5438_s4 + $0x178] sm:$0xff] }
  0x20   :  { %3874 = vmatprep.subr.bf16.mxu1 %v4334_v3 }
  0x23   :  { %3876 = vmatpush3.bf16.msra.mxu1 %v3875_v32  ;;  %v3931_v32 = vpack.c.bf16 %v878_v29, %v877_v27 }
  0x24   :  { %3908 = vmatprep.subr.bf16.mxu1 %v3907_v28 }
  0xde   :  { %v109_v40 = vpop.f32.mrb[0].mxu0 }
  0xdf   :  { %v110_v41 = vadd.f32 %v3041_v39, %v109_v40  ;;  %v3392_v42 = vpop.f32.mrb[1].mxu0  ;;  %v881_v39 = vld [vmem:[%s5438_s4 + $0x190] sm:$0xff]  ;;  %v882_v40 = vld [vmem:[%s5438_s4 + $0x198] sm:$0xff] }
  0xe0   :  { %v3939_v42 = vpack.c.bf16 %v882_v40, %v881_v39 }
  0xe1   :  { %v114_v43 = vand.u32 2147483647, %v110_v41  ;;  %v113_v54 = vmax.f32 %v110_v41, 0.0 }
  0xe3   :  { %v115_v44 = vsub.f32 0.0, %v114_v43 }
  0xe5   :  { %v116_v45 = vmul.f32 1.442695, %v115_v44 }
  0xe7   :  { %4208 = vpow2.f32 %v116_v45 }
  0xf1   :  { %v4209_v46 = vpop.eup %4208 }
  0xf2   :  { %v118_v47 = vadd.f32 1.0, %v4209_v46  ;;  %v121_v48 = vmul.f32 -0.5, %v4209_v46  ;;  %v124_v50 = vand.u32 2147483647, %v4209_v46 }
  0xf4   :  { %4210 = vlog2.f32 %v118_v47  ;;  %v122_v49 = vadd.f32 1.0, %v121_v48  ;;  %vm125_vm2 = vcmp.lt.f32.partialorder %v124_v50, 0.0004427343 }
  0xf6   :  { %v123_v53 = vmul.f32 %v4209_v46, %v122_v49  ;;  %v303_v49 = vlaneseq }
  0xf8   :  { %v4603_v59 = vshrl.u32 %v303_v49, 7 }
  0xfa   :  { %v4625_v6 = vsub.s32 0, %v4603_v59  ;;  %v4662_v27 = vadd.s32 8, %v4603_v59 }
  0xfe   :  { %v4211_v51 = vpop.eup %4210 }
  0xff   :  { %v120_v52 = vmul.f32 0.6931472, %v4211_v51  ;;  %v773_v51 = vld [vmem:[%s5438_s4 + $0x140] sm:$0xff] }
 0x101   :  { %v126_v55 = vsel %vm125_vm2, %v123_v53, %v120_v52  ;;  %v774_v52 = vld [vmem:[%s5438_s4 + $0x148] sm:$0xff]  ;;  %v883_v53 = vld [vmem:[%s5438_s4 + $0x1a0] sm:$0xff] }
 0x102   :  { %v127_v56 = vadd.f32 %v126_v55, %v113_v54  ;;  %v3919_v55 = vpack.c.bf16 %v774_v52, %v773_v51 }
 0x104   :  { %4212 = vtanh.f32 %v127_v56  ;;  %v884_v56 = vld [vmem:[%s5438_s4 + $0x1a8] sm:$0xff] }
 0x10e   :  { %v4213_v57 = vpop.eup %4212 }
 0x10f   :  { %v129_v58 = vmul.f32 %v4213_v57, %v110_v41  ;;  %v3915_v41 = vpack.c.bf16 %v772_v38, %v771_v36  ;;  %v3943_v57 = vpack.c.bf16 %v884_v56, %v883_v53  ;;  %v4678_v38 = vadd.s32 24, %v4603_v59 }
 0x111   :  { %3426 = vmatmul.mubr.f32.vlgmr.msra.gmra.mrb[0].mxu1 %v129_v58  ;;  %v3044_v58 = vld [vmem:[%s5437_s3 + $0x88] ss:$0 sm:$0xff]  ;;  %v653_v51 = vand.u32 15, %v4678_v38 }
 0x112   :  { %3910 = vmatpush3.bf16.msra.mxu1 %v3907_v28 }
 0x113   :  { %3912 = vmatprep.subr.bf16.mxu1 %v3911_v33  ;;  %vm4704_vm6 = vcmp.lt.s32.totalorder %v653_v51, 15  ;;  %vm4944_vm14 = vcmp.lt.s32.totalorder %v653_v51, 14 }
 0x116   :  { %3914 = vmatpush3.bf16.msra.mxu1 %v3911_v33 }
 0x117   :  { %3916 = vmatprep.subr.bf16.mxu1 %v3915_v41 }
 0x11a   :  { %3918 = vmatpush3.bf16.msra.mxu1 %v3915_v41  ;;  %v639_v41 = vand.u32 15, %v4662_v27 }
 0x11b   :  { %3920 = vmatprep.subr.bf16.mxu1 %v3919_v55 }
 0x11c   :  { %vm4690_vm5 = vcmp.lt.s32.totalorder %v639_v41, 15  ;;  %vm4930_vm13 = vcmp.lt.s32.totalorder %v639_v41, 14 }
 0x11e   :  { %3922 = vmatpush3.bf16.msra.mxu1 %v3919_v55 }
 0x1e4   :  { %v217_v1 = vpop.f32.mrb[0].mxu1 }
 0x1e5   :  { %v218_v2 = vadd.f32 %v3043_v62, %v217_v1  ;;  %v3427_v3 = vpop.f32.mrb[1].mxu1  ;;  %v776_v62 = vld [vmem:[%s5438_s4 + $0x158] sm:$0xff] }
 0x1e6   :  { %v3056_v3 = vld [vmem:[%s5438_s4 + $0x20] ss:$0 sm:$0xff] }
 0x1e7   :  { %3437 = vmatmul.mubr.msk.f32.vlgmr.msra.gmra.mrb[2].mxu0 %vm39_vm1, %v218_v2  ;;  %v886_v2 = vld [vmem:[%s5438_s4 + $0x1b8] sm:$0xff] }
 0x1e8   :  { %3886 = vmatpush3.bf16.msra.mxu0 %v3883_v61  ;;  %3447 = vmatprep.mubr.msk.f32.mxu0 %vm39_vm1, %v25_v5  ;;  %v775_v61 = vld [vmem:[%s5438_s4 + $0x150] sm:$0xff] }
 0x1e9   :  { %3888 = vmatprep.subr.bf16.mxu0 %v3887_v4  ;;  %v3923_v1 = vpack.c.bf16 %v776_v62, %v775_v61 }
 0x1eb   :  { %3924 = vmatprep.subr.bf16.mxu1 %v3923_v1 }
 0x1ec   :  { %3890 = vmatpush3.bf16.msra.mxu0 %v3887_v4  ;;  %v3947_v4 = vpack.c.bf16 %v886_v2, %v885_v63  ;;  %3926 = vmatpush3.bf16.msra.mxu1 %v3923_v1  ;;  %v632_v1 = vand.u32 15, %v4603_v59 }
 0x1ed   :  { %3892 = vmatprep.subr.bf16.mxu0 %v3891_v8 }
 0x1ee   :  { %vm4722_vm7 = vcmp.ge.s32.totalorder %v632_v1, 1  ;;  %vm4976_vm15 = vcmp.ge.s32.totalorder %v632_v1, 2 }
 0x1ef   :  { %3448 = vmatmul.mubr.msk.f32.vlgmr.msra.gmra.mrb[4].mxu0 %vm39_vm1, %v26_v11 }
 0x1f0   :  { %3894 = vmatpush3.bf16.msra.mxu0 %v3891_v8  ;;  %3450 = vmatprep.mubr.msk.f32.mxu0 %vm39_vm1, %v27_v12 }
 0x1f1   :  { %3896 = vmatprep.subr.bf16.mxu0 %v3895_v13 }
 0x1f3   :  { %3451 = vmatmul.mubr.msk.f32.gmra.mrb[6].mxu0 %vm39_vm1, %v28_v16 }
 0x1f4   :  { %3898 = vmatpush3.bf16.msra.mxu0 %v3895_v13  ;;  %3461 = vmatprep.mubr.msk.f32.mxu0 %vm39_vm1, %v25_v5 }
 0x1f5   :  { %3900 = vmatprep.subr.bf16.mxu0 %v3899_v17 }
 0x1f7   :  { %3462 = vmatmul.mubr.msk.f32.vlgmr.msra.gmra.mrb[8].mxu0 %vm39_vm1, %v26_v11  ;;  %v778_v11 = vld [vmem:[%s5438_s4 + $0x168] sm:$0xff] }
 0x1f8   :  { %3902 = vmatpush3.bf16.msra.mxu0 %v3899_v17  ;;  %3464 = vmatprep.mubr.msk.f32.mxu0 %vm39_vm1, %v27_v12  ;;  %v887_v12 = vld [vmem:[%s5438_s4 + $0x1c0] sm:$0xff]  ;;  %v3927_v14 = vpack.c.bf16 %v778_v11, %v777_v10  ;;  %v4647_v17 = vsub.s32 1, %v4603_v59 }
 0x1f9   :  { %3904 = vmatprep.subr.bf16.mxu0 %v3903_v20  ;;  %v3951_v19 = vpack.c.bf16 %v888_v15, %v887_v12 }
 0x1fa   :  { %3928 = vmatprep.subr.bf16.mxu1 %v3927_v14 }
 0x1fb   :  { %3465 = vmatmul.mubr.msk.f32.gmra.mrb[10].mxu0 %vm39_vm1, %v28_v16  ;;  %3930 = vmatpush3.bf16.msra.mxu1 %v3927_v14  ;;  %v2136_v14 = vld [vmem:[%s5438_s4 + $0x3d0] sm:$0xff] }
 0x1fc   :  { %3906 = vmatpush3.bf16.msra.mxu0 %v3903_v20  ;;  %3475 = vmatprep.mubr.msk.f32.mxu0 %vm39_vm1, %v21_v21 }
 0x1fd   :  { %3932 = vmatprep.subr.bf16.mxu0 %v3931_v32 }
 0x1ff   :  { %3476 = vmatmul.mubr.msk.f32.vlgmr.msra.gmra.mrb[12].mxu0 %vm39_vm1, %v22_v22 }
 0x200   :  { %3478 = vmatprep.mubr.msk.f32.mxu0 %vm39_vm1, %v23_v23  ;;  %3934 = vmatpush3.bf16.msra.mxu0 %v3931_v32 }
 0x201   :  { %3936 = vmatprep.subr.bf16.mxu0 %v3935_v37 }
 0x203   :  { %3479 = vmatmul.mubr.msk.f32.gmra.mrb[14].mxu0 %vm39_vm1, %v24_v24 }
 0x204   :  { %3938 = vmatpush3.bf16.msra.mxu0 %v3935_v37 }
 0x205   :  { %3940 = vmatprep.subr.bf16.mxu0 %v3939_v42 }
 0x208   :  { %3942 = vmatpush3.bf16.msra.mxu0 %v3939_v42 }
 0x209   :  { %3944 = vmatprep.subr.bf16.mxu0 %v3943_v57 }
 0x20c   :  { %3946 = vmatpush3.bf16.msra.mxu0 %v3943_v57 }
 0x20d   :  { %3948 = vmatprep.subr.bf16.mxu0 %v3947_v4 }
 0x210   :  { %3950 = vmatpush3.bf16.msra.mxu0 %v3947_v4 }
 0x211   :  { %3952 = vmatprep.subr.bf16.mxu0 %v3951_v19 }
 0x214   :  { %3954 = vmatpush3.bf16.msra.mxu0 %v3951_v19 }
 0x2ba   :  { %v299_v43 = vpop.f32.mrb[2].mxu0 }
 0x2bb   :  { %v3438_v44 = vpop.f32.mrb[3].mxu0  ;;  %v300_v5 = vadd.f32 %v3044_v58, %v299_v43 }
 0x2bd   :  { %v4644_v16 = vrot.slane %v300_v5, %v4625_v6  ;;  %v4665_v28 = vrot.slane %v300_v5, %v4647_v17 }
 0x2c2   :  { %v4576_v45 = vpop.f32.mrb[4].mxu0 }
 0x2c3   :  { %v4578_v46 = vpop.f32.mrb[5].mxu0 }
 0x2c6   :  { %v4580_v47 = vpop.f32.mrb[6].mxu0 }
 0x2c7   :  { %v4582_v48 = vpop.f32.mrb[7].mxu0 }
 0x2ca   :  { %v4584_v50 = vpop.f32.mrb[8].mxu0 }
 0x2cb   :  { %v4595_v54 = vpop.f32.mrb[9].mxu0 }
 0x2ce   :  { %v4605_v60 = vpop.f32.mrb[10].mxu0 }
 0x2cf   :  { %v4616_v0 = vpop.f32.mrb[11].mxu0 }
 0x2d2   :  { %v3477_v7 = vpop.f32.mrb[12].mxu0 }
 0x2d3   :  { %v4627_v8 = vadd.f32 %v3477_v7, %v3056_v3  ;;  %v600_v9 = vpop.f32.mrb[13].mxu0 }
 0x2d4   :  { %v4638_v13 = vadd.f32 %v3056_v3, %v600_v9 }
 0x2d5   :  { %v620_v18 = vmax.f32 %v4627_v8, 0.0 }
 0x2d6   :  { %v619_v20 = vmax.f32 %v4638_v13, 0.0  ;;  %v3480_v21 = vpop.f32.mrb[14].mxu0 }
 0x2d7   :  { %v679_v22 = vadd.f32 %v620_v18, %v4644_v16  ;;  %v4654_v23 = vadd.f32 %v3480_v21, %v3056_v3  ;;  %v610_v24 = vpop.f32.mrb[15].mxu0 }
 0x2d8   :  { %v678_v25 = vadd.f32 %v619_v20, %v4644_v16  ;;  %v4659_v26 = vadd.f32 %v3056_v3, %v610_v24  ;;  %v4718_v3 = vadd.s32 16, %v4603_v59 }
 0x2d9   :  { %v694_v29 = vrot.slane %v679_v22, 7  ;;  %v622_v30 = vmax.f32 %v4654_v23, 0.0  ;;  %732 = vrot.lane.b32.xlu0 %v679_v22, %s4337_s29  ;;  %v714_v31 = vrot.slane %v679_v22, 1 }
 0x2da   :  { %v693_v32 = vrot.slane %v678_v25, 7  ;;  %v621_v33 = vmax.f32 %v4659_v26, 0.0  ;;  %v713_v34 = vrot.slane %v678_v25, 1  ;;  %v646_v10 = vand.u32 15, %v4718_v3 }
 0x2db   :  { %v681_v35 = vadd.f32 %v622_v30, %v4665_v28 }
 0x2dc   :  { %v680_v36 = vadd.f32 %v621_v33, %v4665_v28  ;;  %v715_v37 = vsel %vm712_vm3, %v713_v34, %v714_v31  ;;  %v695_v39 = vsel %vm692_vm4, %v693_v32, %v694_v29  ;;  %vm4735_vm10 = vcmp.ge.s32.totalorder %v646_v10, 1 }
 0x2dd   :  { %v687_v40 = vrot.slane %v681_v35, 7  ;;  %730 = vrot.lane.b32.xlu0 %v678_v25, %s4337_s29  ;;  %746 = vrot.lane.b32.xlu1 %v715_v37, %s4338_s30  ;;  %v718_v49 = vrot.slane %v681_v35, 1  ;;  %v1006_v37 = vld [vmem:[%s5438_s4 + $0x1d0] sm:$0xff]  ;;  %vm4989_vm0 = vcmp.ge.s32.totalorder %v646_v10, 2 }
 0x2de   :  { %v696_v42 = vrot.slane %v680_v36, 7  ;;  %v716_v43 = vrot.slane %v680_v36, 1 }
 0x2df   :  { %v703_v44 = vsel %vm692_vm4, %v687_v40, %v693_v32  ;;  %v725_v62 = vsel %vm712_vm3, %v718_v49, %v713_v34 }
 0x2e0   :  { %v717_v53 = vsel %vm712_vm3, %v714_v31, %v716_v43  ;;  %v697_v55 = vsel %vm692_vm4, %v694_v29, %v696_v42  ;;  %v698_v56 = vsel %vm692_vm4, %v696_v42, %v687_v40  ;;  %v719_v57 = vsel %vm712_vm3, %v716_v43, %v718_v49  ;;  %v1111_v40 = vld [vmem:[%s5438_s4 + $0x1f0] sm:$0xff]  ;;  %v1112_v43 = vld [vmem:[%s5438_s4 + $0x1f8] sm:$0xff]  ;;  %v1008_v49 = vld [vmem:[%s5438_s4 + $0x1e0] sm:$0xff] }
 0x2e1   :  { %734 = vrot.lane.b32.xlu0 %v680_v36, %s4337_s29  ;;  %736 = vrot.lane.b32.xlu1 %v681_v35, %s4337_s29  ;;  %v727_v58 = vsel %vm4690_vm5, %v717_v53, 0.0  ;;  %v729_v63 = vsel %vm4704_vm6, %v725_v62, 0.0  ;;  %v704_v7 = vsel %vm4722_vm7, %v703_v44, 0.0  ;;  %v706_v21 = vsel %vm4735_vm10, %v697_v55, 0.0  ;;  %v1009_v53 = vld [vmem:[%s5438_s4 + $0x1e8] sm:$0xff]  ;;  %v1113_v55 = vld [vmem:[%s5438_s4 + $0x200] sm:$0xff] }
 0x2e2   :  { %v3963_v44 = vpack.c.bf16 %v1112_v43, %v1111_v40  ;;  %v3046_v62 = vld [vmem:[%s5437_s3 + $0x90] ss:$0 sm:$0xff] }
 0x2e4   :  { %3964 = vmatprep.subr.bf16.mxu0 %v3963_v44 }
 0x2e5   :  { %750 = vrot.lane.b32.xlu0 %v719_v57, %s4338_s30  ;;  %748 = vrot.lane.b32.xlu1 %v727_v58, %s4338_s30  ;;  %v1114_v57 = vld [vmem:[%s5438_s4 + $0x208] sm:$0xff] }
 0x2e6   :  { %v3967_v58 = vpack.c.bf16 %v1114_v57, %v1113_v55 }
 0x2e9   :  { %1216 = vrot.lane.b32.xlu0 %v4644_v16, %s4339_s6  ;;  %752 = vrot.lane.b32.xlu1 %v729_v63, %s4338_s30  ;;  %v4781_v63 = vadd.f32 %v4576_v45, %v3046_v62 }
 0x2ed   :  { %1218 = vrot.lane.b32.xlu1 %v4665_v28, %s4339_s6 }
 0x34b   :  { %v733_v2 = vpop.permute.xlu0 %732 }
 0x34c   :  { %v759_v22 = vsel %vm39_vm1, %v695_v39, %v733_v2  ;;  %v1007_v39 = vld [vmem:[%s5438_s4 + $0x1d8] sm:$0xff]  ;;  %v4784_v2 = vadd.f32 %v3046_v62, %v4578_v46 }
 0x34d   :  { %v3955_v42 = vpack.c.bf16 %v1007_v39, %v1006_v37 }
 0x34f   :  { %v731_v5 = vpop.permute.xlu0 %730  ;;  %v747_v9 = vpop.permute.xlu1 %746  ;;  %3956 = vmatprep.subr.bf16.mxu1 %v3955_v42 }
 0x350   :  { %v758_v11 = vsel %vm39_vm1, %v704_v7, %v731_v5 }
 0x351   :  { %v763_v12 = vsel %vm762_vm8, %v758_v11, %v747_v9 }
 0x352   :  { %3505 = vmatprep.mubr.msk.f32.mxu1 %vm779_vm9, %v763_v12  ;;  %3535 = vmatprep.mubr.msk.f32.mxu0 %vm779_vm9, %v763_v12 }
 0x353   :  { %v735_v15 = vpop.permute.xlu0 %734  ;;  %v737_v19 = vpop.permute.xlu1 %736 }
 0x354   :  { %v760_v24 = vsel %vm39_vm1, %v706_v21, %v735_v15  ;;  %v761_v34 = vsel %vm39_vm1, %v698_v56, %v737_v19  ;;  %v3959_v56 = vpack.c.bf16 %v1009_v53, %v1008_v49  ;;  %v4789_v19 = vadd.f32 %v4580_v47, %v3046_v62 }
 0x357   :  { %v751_v25 = vpop.permute.xlu0 %750  ;;  %v749_v29 = vpop.permute.xlu1 %748 }
 0x358   :  { %v765_v31 = vsel %vm762_vm8, %v760_v24, %v751_v25  ;;  %v764_v32 = vsel %vm762_vm8, %v759_v22, %v749_v29  ;;  %v4792_v22 = vadd.f32 %v3046_v62, %v4582_v48  ;;  %v3051_v48 = vld [vmem:[%s5437_s3 + $0x98] ss:$0 sm:$0xff] }
 0x359   :  { %3506 = vmatmul.mubr.msk.f32.vlgmr.msra.gmra.mrb[2].mxu1 %vm779_vm9, %v764_v32  ;;  %3536 = vmatmul.mubr.msk.f32.vlgmr.msra.gmra.mrb[16].mxu0 %vm779_vm9, %v764_v32  ;;  %v4800_v40 = vadd.f32 %v4584_v50, %v3051_v48  ;;  %v4808_v49 = vadd.f32 %v4605_v60, %v3051_v48  ;;  %v4811_v55 = vadd.f32 %v3051_v48, %v4616_v0 }
 0x35a   :  { %3508 = vmatprep.mubr.msk.f32.mxu1 %vm779_vm9, %v765_v31  ;;  %3538 = vmatprep.mubr.msk.f32.mxu0 %vm779_vm9, %v765_v31 }
 0x35b   :  { %v753_v35 = vpop.permute.xlu1 %752  ;;  %3958 = vmatpush3.bf16.msra.mxu1 %v3955_v42  ;;  %3966 = vmatpush3.bf16.msra.mxu0 %v3963_v44  ;;  %v4803_v42 = vadd.f32 %v3051_v48, %v4595_v54  ;;  %v1312_v48 = vld [vmem:[%s5438_s4 + $0x220] sm:$0xff] }
 0x35c   :  { %v766_v36 = vsel %vm762_vm8, %v761_v34, %v753_v35  ;;  %3960 = vmatprep.subr.bf16.mxu1 %v3959_v56  ;;  %3968 = vmatprep.subr.bf16.mxu0 %v3967_v58 }
 0x35d   :  { %3509 = vmatmul.mubr.msk.f32.gmra.mrb[4].mxu1 %vm779_vm9, %v766_v36  ;;  %3539 = vmatmul.mubr.msk.f32.gmra.mrb[18].mxu0 %vm779_vm9, %v766_v36 }
 0x35f   :  { %3962 = vmatpush3.bf16.msra.mxu1 %v3959_v56  ;;  %3970 = vmatpush3.bf16.msra.mxu0 %v3967_v58 }
 0x42c   :  { %v3507_v5 = vpop.f32.mrb[2].mxu1  ;;  %v3537_v7 = vpop.f32.mrb[16].mxu0 }
 0x42d   :  { %v864_v9 = vadd.f32 %v3507_v5, %v4781_v63  ;;  %v858_v11 = vpop.f32.mrb[3].mxu1  ;;  %v955_v12 = vpop.f32.mrb[17].mxu0  ;;  %v961_v43 = vadd.f32 %v3537_v7, %v4800_v40 }
 0x42e   :  { %v859_v15 = vadd.f32 %v858_v11, %v4784_v2  ;;  %v956_v44 = vadd.f32 %v955_v12, %v4803_v42 }
 0x42f   :  { %v975_v21 = vsub.f32 0.0, %v864_v9 }
 0x430   :  { %v974_v45 = vsub.f32 0.0, %v859_v15  ;;  %v3510_v24 = vpop.f32.mrb[4].mxu1  ;;  %v3540_v25 = vpop.f32.mrb[18].mxu0 }
 0x431   :  { %v980_v46 = vmul.f32 1.442695, %v975_v21  ;;  %v874_v29 = vadd.f32 %v3510_v24, %v4789_v19  ;;  %v868_v31 = vpop.f32.mrb[5].mxu1  ;;  %v965_v32 = vpop.f32.mrb[19].mxu0  ;;  %v971_v50 = vadd.f32 %v3540_v25, %v4808_v49 }
 0x432   :  { %v978_v34 = vmul.f32 1.442695, %v974_v45  ;;  %v869_v35 = vadd.f32 %v868_v31, %v4792_v22  ;;  %v966_v54 = vadd.f32 %v965_v32, %v4811_v55  ;;  %v1310_v32 = vld [vmem:[%s5438_s4 + $0x210] sm:$0xff] }
 0x433   :  { %4214 = vpow2.f32 %v980_v46  ;;  %v977_v36 = vsub.f32 0.0, %v874_v29 }
 0x434   :  { %4216 = vpow2.f32 %v978_v34  ;;  %v976_v47 = vsub.f32 0.0, %v869_v35  ;;  %v1311_v34 = vld [vmem:[%s5438_s4 + $0x218] sm:$0xff]  ;;  %v1435_v35 = vld [vmem:[%s5438_s4 + $0x270] sm:$0xff] }
 0x435   :  { %v984_v37 = vmul.f32 1.442695, %v977_v36  ;;  %v3971_v36 = vpack.c.bf16 %v1311_v34, %v1310_v32 }
 0x436   :  { %v982_v39 = vmul.f32 1.442695, %v976_v47  ;;  %v1436_v47 = vld [vmem:[%s5438_s4 + $0x278] sm:$0xff] }
 0x437   :  { %4218 = vpow2.f32 %v984_v37  ;;  %v1313_v37 = vld [vmem:[%s5438_s4 + $0x228] sm:$0xff]  ;;  %3972 = vmatprep.subr.bf16.mxu1 %v3971_v36 }
 0x438   :  { %4220 = vpow2.f32 %v982_v39  ;;  %v3995_v39 = vpack.c.bf16 %v1436_v47, %v1435_v35  ;;  %v1321_v47 = vld [vmem:[%s5438_s4 + $0x268] sm:$0xff] }
 0x439   :  { %4222 = vtanh.f32 %v961_v43  ;;  %v3975_v43 = vpack.c.bf16 %v1313_v37, %v1312_v48  ;;  %v1445_v48 = vld [vmem:[%s5438_s4 + $0x2c0] sm:$0xff] }
 0x43a   :  { %4224 = vtanh.f32 %v956_v44  ;;  %v1437_v44 = vld [vmem:[%s5438_s4 + $0x280] sm:$0xff]  ;;  %3996 = vmatprep.subr.bf16.mxu0 %v3995_v39 }
 0x43d   :  { %v4215_v53 = vpop.eup %4214 }
 0x43e   :  { %v4217_v56 = vpop.eup %4216  ;;  %v987_v57 = vadd.f32 1.0, %v4215_v53  ;;  %v1438_v53 = vld [vmem:[%s5438_s4 + $0x288] sm:$0xff] }
 0x43f   :  { %v986_v58 = vadd.f32 1.0, %v4217_v56  ;;  %v1314_v56 = vld [vmem:[%s5438_s4 + $0x230] sm:$0xff] }
 0x440   :  { %4226 = vrcp.f32 %v987_v57  ;;  %v3999_v57 = vpack.c.bf16 %v1438_v53, %v1437_v44 }
 0x441   :  { %v4219_v62 = vpop.eup %4218  ;;  %4228 = vrcp.f32 %v986_v58  ;;  %v1439_v58 = vld [vmem:[%s5438_s4 + $0x290] sm:$0xff] }
 0x442   :  { %v4221_v5 = vpop.eup %4220  ;;  %v989_v7 = vadd.f32 1.0, %v4219_v62  ;;  %4230 = vtanh.f32 %v971_v50  ;;  %v1315_v50 = vld [vmem:[%s5438_s4 + $0x238] sm:$0xff] }
 0x443   :  { %v988_v60 = vadd.f32 1.0, %v4221_v5  ;;  %4232 = vtanh.f32 %v966_v54  ;;  %v4223_v0 = vpop.eup %4222  ;;  %v1440_v54 = vld [vmem:[%s5438_s4 + $0x298] sm:$0xff]  ;;  %v3979_v62 = vpack.c.bf16 %v1315_v50, %v1314_v56 }
 0x444   :  { %4234 = vrcp.f32 %v989_v7  ;;  %v4225_v9 = vpop.eup %4224  ;;  %v4003_v5 = vpack.c.bf16 %v1440_v54, %v1439_v58  ;;  %v1316_v7 = vld [vmem:[%s5438_s4 + $0x240] sm:$0xff] }
 0x445   :  { %4236 = vrcp.f32 %v988_v60  ;;  %v1317_v60 = vld [vmem:[%s5438_s4 + $0x248] sm:$0xff] }
 0x44a   :  { %v4227_v11 = vpop.eup %4226 }
 0x44b   :  { %v4229_v12 = vpop.eup %4228  ;;  %v1003_v15 = vmul.f32 %v4227_v11, %v4223_v0  ;;  %v1441_v0 = vld [vmem:[%s5438_s4 + $0x2a0] sm:$0xff]  ;;  %v3983_v11 = vpack.c.bf16 %v1317_v60, %v1316_v7 }
 0x44c   :  { %v4231_v21 = vpop.eup %4230  ;;  %v1002_v45 = vmul.f32 %v4229_v12, %v4225_v9  ;;  %v1442_v9 = vld [vmem:[%s5438_s4 + $0x2a8] sm:$0xff] }
 0x44d   :  { %v4233_v24 = vpop.eup %4232  ;;  %v4007_v12 = vpack.c.bf16 %v1442_v9, %v1441_v0 }
 0x44e   :  { %v4235_v25 = vpop.eup %4234  ;;  %3549 = vmatprep.mubr.msk.f32.mxu1 %vm39_vm1, %v1002_v45  ;;  %3563 = vmatprep.mubr.msk.f32.mxu0 %vm39_vm1, %v1002_v45  ;;  %v1318_v45 = vld [vmem:[%s5438_s4 + $0x250] sm:$0xff] }
 0x44f   :  { %v4237_v46 = vpop.eup %4236  ;;  %3550 = vmatmul.mubr.msk.f32.vlgmr.msra.gmra.mrb[6].mxu1 %vm39_vm1, %v1003_v15  ;;  %3564 = vmatmul.mubr.msk.f32.vlgmr.msra.gmra.mrb[20].mxu0 %vm39_vm1, %v1003_v15  ;;  %v1005_v29 = vmul.f32 %v4235_v25, %v4231_v21  ;;  %v4874_v15 = vld [vmem:[%s5438_s4 + $0x100] sm:$0xf]  ;;  %v1443_v25 = vld [vmem:[%s5438_s4 + $0x2b0] sm:$0xff] }
 0x450   :  { %v1004_v31 = vmul.f32 %v4237_v46, %v4233_v24  ;;  %3974 = vmatpush3.bf16.msra.mxu1 %v3971_v36  ;;  %3998 = vmatpush3.bf16.msra.mxu0 %v3995_v39  ;;  %v1013_v21 = vrot.slane %v4874_v15, %v4625_v6  ;;  %v1319_v24 = vld [vmem:[%s5438_s4 + $0x258] sm:$0xff]  ;;  %v1320_v36 = vld [vmem:[%s5438_s4 + $0x260] sm:$0xff] }
 0x451   :  { %3976 = vmatprep.subr.bf16.mxu1 %v3975_v43  ;;  %4000 = vmatprep.subr.bf16.mxu0 %v3999_v57  ;;  %v3987_v46 = vpack.c.bf16 %v1319_v24, %v1318_v45  ;;  %v3991_v39 = vpack.c.bf16 %v1321_v47, %v1320_v36 }
 0x452   :  { %3552 = vmatprep.mubr.msk.f32.mxu1 %vm39_vm1, %v1004_v31  ;;  %3566 = vmatprep.mubr.msk.f32.mxu0 %vm39_vm1, %v1004_v31 }
 0x453   :  { %3553 = vmatmul.mubr.msk.f32.gmra.mrb[8].mxu1 %vm39_vm1, %v1005_v29  ;;  %3567 = vmatmul.mubr.msk.f32.gmra.mrb[22].mxu0 %vm39_vm1, %v1005_v29  ;;  %v1444_v29 = vld [vmem:[%s5438_s4 + $0x2b8] sm:$0xff] }
 0x454   :  { %3978 = vmatpush3.bf16.msra.mxu1 %v3975_v43  ;;  %4002 = vmatpush3.bf16.msra.mxu0 %v3999_v57  ;;  %v4011_v31 = vpack.c.bf16 %v1444_v29, %v1443_v25  ;;  %v1446_v43 = vld [vmem:[%s5438_s4 + $0x2c8] sm:$0xff] }
 0x455   :  { %3980 = vmatprep.subr.bf16.mxu1 %v3979_v62  ;;  %4004 = vmatprep.subr.bf16.mxu0 %v4003_v5  ;;  %v4015_v53 = vpack.c.bf16 %v1446_v43, %v1445_v48 }
 0x458   :  { %3982 = vmatpush3.bf16.msra.mxu1 %v3979_v62  ;;  %4006 = vmatpush3.bf16.msra.mxu0 %v4003_v5  ;;  %v1217_v62 = vpop.permute.xlu0 %1216 }
 0x459   :  { %3984 = vmatprep.subr.bf16.mxu1 %v3983_v11  ;;  %4008 = vmatprep.subr.bf16.mxu0 %v4007_v12 }
 0x45c   :  { %3986 = vmatpush3.bf16.msra.mxu1 %v3983_v11  ;;  %4010 = vmatpush3.bf16.msra.mxu0 %v4007_v12  ;;  %v1219_v11 = vpop.permute.xlu1 %1218 }
 0x45d   :  { %3988 = vmatprep.subr.bf16.mxu1 %v3987_v46  ;;  %4012 = vmatprep.subr.bf16.mxu0 %v4011_v31 }
 0x460   :  { %3990 = vmatpush3.bf16.msra.mxu1 %v3987_v46  ;;  %4014 = vmatpush3.bf16.msra.mxu0 %v4011_v31 }
 0x461   :  { %3992 = vmatprep.subr.bf16.mxu1 %v3991_v39  ;;  %4016 = vmatprep.subr.bf16.mxu0 %v4015_v53 }
 0x464   :  { %3994 = vmatpush3.bf16.msra.mxu1 %v3991_v39  ;;  %4018 = vmatpush3.bf16.msra.mxu0 %v4015_v53 }
 0x522   :  { %v3551_v32 = vpop.f32.mrb[6].mxu1 }
 0x523   :  { %v1098_v34 = vadd.f32 %v3551_v32, %v1013_v21  ;;  %v1092_v35 = vpop.f32.mrb[7].mxu1 }
 0x524   :  { %v1093_v37 = vadd.f32 %v1092_v35, %v1013_v21 }
 0x525   :  { %v1205_v44 = vadd.f32 %v1098_v34, %v620_v18 }
 0x526   :  { %v1204_v56 = vadd.f32 %v1093_v37, %v619_v20  ;;  %v3554_v57 = vpop.f32.mrb[8].mxu1 }
 0x527   :  { %v4906_v50 = vmul.f32 0.70710677, %v1205_v44  ;;  %v1108_v58 = vadd.f32 %v3554_v57, %v1013_v21  ;;  %v1102_v54 = vpop.f32.mrb[9].mxu1 }
 0x528   :  { %v4908_v5 = vmul.f32 0.70710677, %v1204_v56  ;;  %v1103_v7 = vadd.f32 %v1102_v54, %v1013_v21  ;;  %v2692_v54 = vld [vmem:[%s5438_s4 + $0x4f0] sm:$0xff] }
 0x529   :  { %v1207_v8 = vadd.f32 %v1108_v58, %v622_v30  ;;  %v1223_v18 = vadd.f32 %v1217_v62, %v4906_v50 }
 0x52a   :  { %v1206_v13 = vadd.f32 %v1103_v7, %v621_v33  ;;  %v1222_v20 = vadd.f32 %v1217_v62, %v4908_v5 }
 0x52b   :  { %v4916_v60 = vmul.f32 0.70710677, %v1207_v8  ;;  %1276 = vrot.lane.b32.xlu1 %v1223_v18, %s4337_s29  ;;  %v1258_v0 = vrot.slane %v1223_v18, 2  ;;  %v1238_v9 = vrot.slane %v1223_v18, 6 }
 0x52c   :  { %v4919_v12 = vmul.f32 0.70710677, %v1206_v13  ;;  %1274 = vrot.lane.b32.xlu0 %v1222_v20, %s4337_s29  ;;  %v1257_v23 = vrot.slane %v1222_v20, 2  ;;  %v1237_v30 = vrot.slane %v1222_v20, 6 }
 0x52d   :  { %v1225_v26 = vadd.f32 %v1219_v11, %v4916_v60 }
 0x52e   :  { %v1224_v33 = vadd.f32 %v1219_v11, %v4919_v12  ;;  %v1259_v21 = vsel %vm1256_vm11, %v1257_v23, %v1258_v0  ;;  %v1239_v45 = vsel %vm1236_vm12, %v1237_v30, %v1238_v9  ;;  %v1581_v11 = vld [vmem:[%s5438_s4 + $0x2d8] sm:$0xff] }
 0x52f   :  { %1280 = vrot.lane.b32.xlu1 %v1225_v26, %s4337_s29  ;;  %v1231_v24 = vrot.slane %v1225_v26, 6  ;;  %v1262_v29 = vrot.slane %v1225_v26, 2  ;;  %v1686_v26 = vld [vmem:[%s5438_s4 + $0x2f8] sm:$0xff] }
 0x530   :  { %1290 = vrot.lane.b32.xlu0 %v1259_v21, %s4338_s30  ;;  %v1260_v46 = vrot.slane %v1224_v33, 2  ;;  %v1240_v31 = vrot.slane %v1224_v33, 6  ;;  %v1582_v21 = vld [vmem:[%s5438_s4 + $0x2e0] sm:$0xff] }
 0x531   :  { %v1247_v32 = vsel %vm1236_vm12, %v1231_v24, %v1237_v30  ;;  %v1269_v41 = vsel %vm1256_vm11, %v1262_v29, %v1257_v23  ;;  %v1685_v23 = vld [vmem:[%s5438_s4 + $0x2f0] sm:$0xff] }
 0x532   :  { %v1261_v34 = vsel %vm1256_vm11, %v1258_v0, %v1260_v46  ;;  %v1242_v36 = vsel %vm1236_vm12, %v1240_v31, %v1231_v24  ;;  %v1241_v47 = vsel %vm1236_vm12, %v1238_v9, %v1240_v31  ;;  %v1273_v48 = vsel %vm4944_vm14, %v1269_v41, 0.0  ;;  %v1580_v9 = vld [vmem:[%s5438_s4 + $0x2d0] sm:$0xff]  ;;  %v1687_v24 = vld [vmem:[%s5438_s4 + $0x300] sm:$0xff] }
 0x533   :  { %v1271_v35 = vsel %vm4930_vm13, %v1261_v34, 0.0  ;;  %v1263_v37 = vsel %vm1256_vm11, %v1260_v46, %v1262_v29  ;;  %v1248_v43 = vsel %vm4976_vm15, %v1247_v32, 0.0  ;;  %v1250_v8 = vsel %vm4989_vm0, %v1241_v47, 0.0  ;;  %v1688_v29 = vld [vmem:[%s5438_s4 + $0x308] sm:$0xff] }
 0x534   :  { %1292 = vrot.lane.b32.xlu1 %v1271_v35, %s4338_s30  ;;  %1278 = vrot.lane.b32.xlu0 %v1224_v33, %s4337_s29  ;;  %v4019_v30 = vpack.c.bf16 %v1581_v11, %v1580_v9  ;;  %v4027_v33 = vpack.c.bf16 %v1686_v26, %v1685_v23  ;;  %v4031_v31 = vpack.c.bf16 %v1688_v29, %v1687_v24 }
 0x536   :  { %4020 = vmatprep.subr.bf16.mxu1 %v4019_v30  ;;  %4028 = vmatprep.subr.bf16.mxu0 %v4027_v33 }
 0x538   :  { %1296 = vrot.lane.b32.xlu1 %v1273_v48, %s4338_s30  ;;  %1294 = vrot.lane.b32.xlu0 %v1263_v37, %s4338_s30 }
 0x53c   :  { %1328 = vrot.lane.b32.xlu1 %v4781_v63, %s4339_s6  ;;  %1326 = vrot.lane.b32.xlu0 %v4784_v2, %s4339_s6 }
 0x540   :  { %1332 = vrot.lane.b32.xlu1 %v4789_v19, %s4339_s6  ;;  %1330 = vrot.lane.b32.xlu0 %v4792_v22, %s4339_s6 }
 0x544   :  { %1453 = vrot.lane.b32.xlu1 %v4800_v40, %s4339_s6  ;;  %1451 = vrot.lane.b32.xlu0 %v4803_v42, %s4339_s6 }
 0x548   :  { %1457 = vrot.lane.b32.xlu1 %v4808_v49, %s4339_s6  ;;  %1455 = vrot.lane.b32.xlu0 %v4811_v55, %s4339_s6 }
 0x54c   :  { %1792 = vrot.lane.b32.xlu1 %v4665_v28, %s4338_s30  ;;  %1790 = vrot.lane.b32.xlu0 %v4644_v16, %s4338_s30 }
 0x59d   :  { %v1277_v38 = vpop.permute.xlu1 %1276 }
 0x59e   :  { %v1275_v39 = vpop.permute.xlu0 %1274  ;;  %v1303_v58 = vsel %vm39_vm1, %v1239_v45, %v1277_v38  ;;  %v1583_v45 = vld [vmem:[%s5438_s4 + $0x2e8] sm:$0xff] }
 0x59f   :  { %v1302_v53 = vsel %vm39_vm1, %v1248_v43, %v1275_v39  ;;  %v4023_v46 = vpack.c.bf16 %v1583_v45, %v1582_v21 }
 0x5a1   :  { %v1281_v44 = vpop.permute.xlu1 %1280 }
 0x5a2   :  { %v1291_v56 = vpop.permute.xlu0 %1290  ;;  %v1305_v18 = vsel %vm39_vm1, %v1242_v36, %v1281_v44 }
 0x5a3   :  { %v1306_v57 = vsel %vm762_vm8, %v1302_v53, %v1291_v56 }
 0x5a4   :  { %3593 = vmatprep.mubr.msk.f32.mxu1 %vm779_vm9, %v1306_v57  ;;  %3623 = vmatprep.mubr.msk.f32.mxu0 %vm779_vm9, %v1306_v57 }
 0x5a6   :  { %v1293_v1 = vpop.permute.xlu1 %1292  ;;  %v1279_v62 = vpop.permute.xlu0 %1278 }
 0x5a7   :  { %v1307_v7 = vsel %vm762_vm8, %v1303_v58, %v1293_v1  ;;  %v1304_v13 = vsel %vm39_vm1, %v1250_v8, %v1279_v62 }
 0x5a8   :  { %3594 = vmatmul.mubr.msk.f32.vlgmr.msra.gmra.mrb[10].mxu1 %vm779_vm9, %v1307_v7  ;;  %3624 = vmatmul.mubr.msk.f32.vlgmr.msra.gmra.mrb[24].mxu0 %vm779_vm9, %v1307_v7 }
 0x5a9   :  { %4022 = vmatpush3.bf16.msra.mxu1 %v4019_v30  ;;  %4030 = vmatpush3.bf16.msra.mxu0 %v4027_v33 }
 0x5aa   :  { %v1297_v20 = vpop.permute.xlu1 %1296  ;;  %v1295_v3 = vpop.permute.xlu0 %1294  ;;  %4024 = vmatprep.subr.bf16.mxu1 %v4023_v46  ;;  %4032 = vmatprep.subr.bf16.mxu0 %v4031_v31 }
 0x5ab   :  { %v1309_v10 = vsel %vm762_vm8, %v1305_v18, %v1297_v20  ;;  %v1308_v0 = vsel %vm762_vm8, %v1304_v13, %v1295_v3 }
 0x5ac   :  { %3596 = vmatprep.mubr.msk.f32.mxu1 %vm779_vm9, %v1308_v0  ;;  %3626 = vmatprep.mubr.msk.f32.mxu0 %vm779_vm9, %v1308_v0 }
 0x5ad   :  { %3597 = vmatmul.mubr.msk.f32.gmra.mrb[12].mxu1 %vm779_vm9, %v1309_v10  ;;  %3627 = vmatmul.mubr.msk.f32.gmra.mrb[26].mxu0 %vm779_vm9, %v1309_v10 }
 0x5ae   :  { %4026 = vmatpush3.bf16.msra.mxu1 %v4023_v46  ;;  %4034 = vmatpush3.bf16.msra.mxu0 %v4031_v31  ;;  %v1329_v32 = vpop.permute.xlu1 %1328  ;;  %v1327_v34 = vpop.permute.xlu0 %1326 }
 0x5b2   :  { %v1333_v39 = vpop.permute.xlu1 %1332  ;;  %v1331_v43 = vpop.permute.xlu0 %1330 }
 0x5b6   :  { %v1454_v10 = vpop.permute.xlu1 %1453  ;;  %v1452_v0 = vpop.permute.xlu0 %1451 }
 0x5ba   :  { %v1458_v26 = vpop.permute.xlu1 %1457  ;;  %v1456_v21 = vpop.permute.xlu0 %1455 }
 0x67b   :  { %v3595_v35 = vpop.f32.mrb[10].mxu1  ;;  %v3625_v36 = vpop.f32.mrb[24].mxu0 }
 0x67c   :  { %v1422_v47 = vadd.f32 %v3595_v35, %v1329_v32  ;;  %v1416_v41 = vpop.f32.mrb[11].mxu1  ;;  %v1529_v48 = vpop.f32.mrb[25].mxu0  ;;  %v1535_v9 = vadd.f32 %v3625_v36, %v1454_v10  ;;  %v1998_v10 = vld [vmem:[%s5438_s4 + $0x388] sm:$0xff] }
 0x67d   :  { %v1417_v37 = vadd.f32 %v1416_v41, %v1327_v34  ;;  %v1530_v11 = vadd.f32 %v1529_v48, %v1452_v0  ;;  %v1878_v0 = vld [vmem:[%s5438_s4 + $0x330] sm:$0xff] }
 0x67e   :  { %v1549_v38 = vsub.f32 0.0, %v1422_v47 }
 0x67f   :  { %v1548_v44 = vsub.f32 0.0, %v1417_v37 }
 0x680   :  { %v1554_v53 = vmul.f32 1.442695, %v1549_v38  ;;  %v3598_v56 = vpop.f32.mrb[12].mxu1  ;;  %v3628_v57 = vpop.f32.mrb[26].mxu0 }
 0x681   :  { %v1552_v58 = vmul.f32 1.442695, %v1548_v44  ;;  %v1432_v1 = vadd.f32 %v3598_v56, %v1333_v39  ;;  %v1426_v62 = vpop.f32.mrb[13].mxu1  ;;  %v1539_v7 = vpop.f32.mrb[27].mxu0  ;;  %v1545_v24 = vadd.f32 %v3628_v57, %v1458_v26  ;;  %v1874_v57 = vld [vmem:[%s5438_s4 + $0x310] sm:$0xff] }
 0x682   :  { %4238 = vpow2.f32 %v1554_v53  ;;  %v1427_v8 = vadd.f32 %v1426_v62, %v1331_v43  ;;  %v1540_v46 = vadd.f32 %v1539_v7, %v1456_v21  ;;  %v1996_v7 = vld [vmem:[%s5438_s4 + $0x378] sm:$0xff]  ;;  %v1880_v21 = vld [vmem:[%s5438_s4 + $0x340] sm:$0xff] }
 0x683   :  { %4240 = vpow2.f32 %v1552_v58  ;;  %v1551_v18 = vsub.f32 0.0, %v1432_v1  ;;  %v1875_v58 = vld [vmem:[%s5438_s4 + $0x318] sm:$0xff]  ;;  %v1995_v1 = vld [vmem:[%s5438_s4 + $0x370] sm:$0xff] }
 0x684   :  { %v1550_v13 = vsub.f32 0.0, %v1427_v8  ;;  %v4035_v62 = vpack.c.bf16 %v1875_v58, %v1874_v57  ;;  %v1876_v8 = vld [vmem:[%s5438_s4 + $0x320] sm:$0xff] }
 0x685   :  { %v1558_v20 = vmul.f32 1.442695, %v1551_v18  ;;  %v1877_v18 = vld [vmem:[%s5438_s4 + $0x328] sm:$0xff] }
 0x686   :  { %v1556_v3 = vmul.f32 1.442695, %v1550_v13  ;;  %v4059_v13 = vpack.c.bf16 %v1996_v7, %v1995_v1  ;;  %4036 = vmatprep.subr.bf16.mxu1 %v4035_v62  ;;  %v2006_v1 = vld [vmem:[%s5438_s4 + $0x3c8] sm:$0xff] }
 0x687   :  { %4242 = vpow2.f32 %v1558_v20  ;;  %v4039_v20 = vpack.c.bf16 %v1877_v18, %v1876_v8 }
 0x688   :  { %4244 = vpow2.f32 %v1556_v3  ;;  %v1997_v3 = vld [vmem:[%s5438_s4 + $0x380] sm:$0xff]  ;;  %4060 = vmatprep.subr.bf16.mxu0 %v4059_v13 }
 0x689   :  { %4246 = vtanh.f32 %v1535_v9  ;;  %v4063_v9 = vpack.c.bf16 %v1998_v10, %v1997_v3 }
 0x68a   :  { %4248 = vtanh.f32 %v1530_v11  ;;  %v1879_v11 = vld [vmem:[%s5438_s4 + $0x338] sm:$0xff] }
 0x68b   :  { %v4043_v26 = vpack.c.bf16 %v1879_v11, %v1878_v0 }
 0x68c   :  { %v4239_v23 = vpop.eup %4238 }
 0x68d   :  { %v4241_v30 = vpop.eup %4240  ;;  %v1561_v33 = vadd.f32 1.0, %v4239_v23  ;;  %v1999_v23 = vld [vmem:[%s5438_s4 + $0x390] sm:$0xff] }
 0x68e   :  { %v1560_v45 = vadd.f32 1.0, %v4241_v30  ;;  %v2000_v30 = vld [vmem:[%s5438_s4 + $0x398] sm:$0xff] }
 0x68f   :  { %4250 = vrcp.f32 %v1561_v33  ;;  %v4067_v33 = vpack.c.bf16 %v2000_v30, %v1999_v23 }
 0x690   :  { %4252 = vrcp.f32 %v1560_v45  ;;  %v1881_v45 = vld [vmem:[%s5438_s4 + $0x348] sm:$0xff] }
 0x691   :  { %v4243_v29 = vpop.eup %4242  ;;  %4254 = vtanh.f32 %v1545_v24  ;;  %v2001_v24 = vld [vmem:[%s5438_s4 + $0x3a0] sm:$0xff] }
 0x692   :  { %v4245_v31 = vpop.eup %4244  ;;  %v1563_v32 = vadd.f32 1.0, %v4243_v29  ;;  %4256 = vtanh.f32 %v1540_v46  ;;  %v2002_v46 = vld [vmem:[%s5438_s4 + $0x3a8] sm:$0xff]  ;;  %v4047_v29 = vpack.c.bf16 %v1881_v45, %v1880_v21  ;;  %v1793_v45 = vpop.permute.xlu1 %1792 }
 0x693   :  { %v1562_v34 = vadd.f32 1.0, %v4245_v31  ;;  %v4247_v35 = vpop.eup %4246  ;;  %v4071_v31 = vpack.c.bf16 %v2002_v46, %v2001_v24 }
 0x694   :  { %4258 = vrcp.f32 %v1563_v32  ;;  %v4249_v36 = vpop.eup %4248  ;;  %v1587_v32 = vrot.slane %v4874_v15, %v4647_v17 }
 0x695   :  { %4260 = vrcp.f32 %v1562_v34  ;;  %v1882_v34 = vld [vmem:[%s5438_s4 + $0x350] sm:$0xff] }
 0x699   :  { %v4251_v47 = vpop.eup %4250 }
 0x69a   :  { %v4253_v41 = vpop.eup %4252  ;;  %v1577_v48 = vmul.f32 %v4251_v47, %v4247_v35  ;;  %v1883_v35 = vld [vmem:[%s5438_s4 + $0x358] sm:$0xff] }
 0x69b   :  { %v1576_v37 = vmul.f32 %v4253_v41, %v4249_v36  ;;  %v4255_v38 = vpop.eup %4254  ;;  %v2003_v36 = vld [vmem:[%s5438_s4 + $0x3b0] sm:$0xff]  ;;  %v4051_v47 = vpack.c.bf16 %v1883_v35, %v1882_v34  ;;  %v2004_v41 = vld [vmem:[%s5438_s4 + $0x3b8] sm:$0xff] }
 0x69c   :  { %v4257_v39 = vpop.eup %4256 }
 0x69d   :  { %3637 = vmatprep.mubr.msk.f32.mxu1 %vm39_vm1, %v1576_v37  ;;  %3651 = vmatprep.mubr.msk.f32.mxu0 %vm39_vm1, %v1576_v37 }
 0x69e   :  { %v4259_v43 = vpop.eup %4258  ;;  %3638 = vmatmul.mubr.msk.f32.vlgmr.msra.gmra.mrb[14].mxu1 %vm39_vm1, %v1577_v48  ;;  %3652 = vmatmul.mubr.msk.f32.vlgmr.msra.gmra.mrb[20].mxu0 %vm39_vm1, %v1577_v48  ;;  %v4075_v48 = vpack.c.bf16 %v2004_v41, %v2003_v36 }
 0x69f   :  { %v4261_v44 = vpop.eup %4260  ;;  %v1579_v53 = vmul.f32 %v4259_v43, %v4255_v38  ;;  %4038 = vmatpush3.bf16.msra.mxu1 %v4035_v62  ;;  %4062 = vmatpush3.bf16.msra.mxu0 %v4059_v13  ;;  %v1791_v13 = vpop.permute.xlu0 %1790 }
 0x6a0   :  { %v1578_v56 = vmul.f32 %v4261_v44, %v4257_v39  ;;  %4040 = vmatprep.subr.bf16.mxu1 %v4039_v20  ;;  %4064 = vmatprep.subr.bf16.mxu0 %v4063_v9  ;;  %v1884_v44 = vld [vmem:[%s5438_s4 + $0x360] sm:$0xff] }
 0x6a2   :  { %3640 = vmatprep.mubr.msk.f32.mxu1 %vm39_vm1, %v1578_v56  ;;  %3654 = vmatprep.mubr.msk.f32.mxu0 %vm39_vm1, %v1578_v56  ;;  %v2005_v56 = vld [vmem:[%s5438_s4 + $0x3c0] sm:$0xff] }
 0x6a3   :  { %3641 = vmatmul.mubr.msk.f32.gmra.mrb[16].mxu1 %vm39_vm1, %v1579_v53  ;;  %3655 = vmatmul.mubr.msk.f32.gmra.mrb[22].mxu0 %vm39_vm1, %v1579_v53  ;;  %v1885_v53 = vld [vmem:[%s5438_s4 + $0x368] sm:$0xff]  ;;  %v4079_v7 = vpack.c.bf16 %v2006_v1, %v2005_v56 }
 0x6a4   :  { %4042 = vmatpush3.bf16.msra.mxu1 %v4039_v20  ;;  %4066 = vmatpush3.bf16.msra.mxu0 %v4063_v9  ;;  %v4055_v58 = vpack.c.bf16 %v1885_v53, %v1884_v44 }
 0x6a5   :  { %4044 = vmatprep.subr.bf16.mxu1 %v4043_v26  ;;  %4068 = vmatprep.subr.bf16.mxu0 %v4067_v33 }
 0x6a8   :  { %4046 = vmatpush3.bf16.msra.mxu1 %v4043_v26  ;;  %4070 = vmatpush3.bf16.msra.mxu0 %v4067_v33 }
 0x6a9   :  { %4048 = vmatprep.subr.bf16.mxu1 %v4047_v29  ;;  %4072 = vmatprep.subr.bf16.mxu0 %v4071_v31 }
 0x6ac   :  { %4050 = vmatpush3.bf16.msra.mxu1 %v4047_v29  ;;  %4074 = vmatpush3.bf16.msra.mxu0 %v4071_v31 }
 0x6ad   :  { %4052 = vmatprep.subr.bf16.mxu1 %v4051_v47  ;;  %4076 = vmatprep.subr.bf16.mxu0 %v4075_v48 }
 0x6b0   :  { %4054 = vmatpush3.bf16.msra.mxu1 %v4051_v47  ;;  %4078 = vmatpush3.bf16.msra.mxu0 %v4075_v48 }
 0x6b1   :  { %4056 = vmatprep.subr.bf16.mxu1 %v4055_v58  ;;  %4080 = vmatprep.subr.bf16.mxu0 %v4079_v7 }
 0x6b4   :  { %4058 = vmatpush3.bf16.msra.mxu1 %v4055_v58  ;;  %4082 = vmatpush3.bf16.msra.mxu0 %v4079_v7 }
 0x771   :  { %v3639_v37 = vpop.f32.mrb[14].mxu1 }
 0x772   :  { %v1672_v38 = vadd.f32 %v3639_v37, %v1587_v32  ;;  %v1666_v39 = vpop.f32.mrb[15].mxu1 }
 0x773   :  { %v1667_v43 = vadd.f32 %v1666_v39, %v1587_v32 }
 0x774   :  { %v1779_v57 = vadd.f32 %v1672_v38, %v4906_v50 }
 0x775   :  { %v1778_v62 = vadd.f32 %v1667_v43, %v4908_v5 }
 0x776   :  { %v5114_v8 = vmul.f32 0.70710677, %v1779_v57  ;;  %v3642_v18 = vpop.f32.mrb[16].mxu1 }
 0x777   :  { %v5116_v20 = vmul.f32 0.70710677, %v1778_v62  ;;  %v1682_v3 = vadd.f32 %v3642_v18, %v1587_v32  ;;  %v1676_v10 = vpop.f32.mrb[17].mxu1 }
 0x778   :  { %v1677_v50 = vadd.f32 %v1676_v10, %v1587_v32  ;;  %v1797_v0 = vadd.f32 %v1791_v13, %v5114_v8 }
 0x779   :  { %v1781_v9 = vadd.f32 %v1682_v3, %v4916_v60  ;;  %v1796_v5 = vadd.f32 %v1791_v13, %v5116_v20 }
 0x77a   :  { %v1780_v11 = vadd.f32 %v1677_v50, %v4919_v12  ;;  %1840 = vrot.lane.b32.xlu1 %v1797_v0, %s4337_s29  ;;  %v1822_v23 = vrot.slane %v1797_v0, 1  ;;  %v1807_v30 = vrot.slane %v1797_v0, 7  ;;  %v2137_v0 = vld [vmem:[%s5438_s4 + $0x3d8] sm:$0xff] }
 0x77b   :  { %v5123_v26 = vmul.f32 0.70710677, %v1781_v9  ;;  %1838 = vrot.lane.b32.xlu0 %v1796_v5, %s4337_s29  ;;  %v1821_v33 = vrot.slane %v1796_v5, 1  ;;  %v1806_v21 = vrot.slane %v1796_v5, 7  ;;  %v2241_v9 = vld [vmem:[%s5438_s4 + $0x3f0] sm:$0xff]  ;;  %v4083_v5 = vpack.c.bf16 %v2137_v0, %v2136_v14 }
 0x77c   :  { %v5126_v24 = vmul.f32 0.70710677, %v1780_v11  ;;  %v2242_v11 = vld [vmem:[%s5438_s4 + $0x3f8] sm:$0xff] }
 0x77d   :  { %v1799_v46 = vadd.f32 %v1793_v45, %v5123_v26  ;;  %v1823_v60 = vsel %vm712_vm3, %v1821_v33, %v1822_v23  ;;  %v1808_v29 = vsel %vm692_vm4, %v1806_v21, %v1807_v30  ;;  %4084 = vmatprep.subr.bf16.mxu1 %v4083_v5 }
 0x77e   :  { %v1798_v12 = vadd.f32 %v1793_v45, %v5126_v24 }
 0x77f   :  { %1844 = vrot.lane.b32.xlu1 %v1799_v46, %s4337_s29  ;;  %v1801_v31 = vrot.slane %v1799_v46, 7  ;;  %1854 = vrot.lane.b32.xlu0 %v1823_v60, %s4338_s30  ;;  %v1826_v34 = vrot.slane %v1799_v46, 1  ;;  %v2244_v46 = vld [vmem:[%s5438_s4 + $0x408] sm:$0xff] }
 0x780   :  { %v1824_v32 = vrot.slane %v1798_v12, 1  ;;  %v1809_v35 = vrot.slane %v1798_v12, 7 }
 0x781   :  { %v1816_v36 = vsel %vm692_vm4, %v1801_v31, %v1806_v21  ;;  %v1833_v38 = vsel %vm712_vm3, %v1826_v34, %v1821_v33  ;;  %v2139_v33 = vld [vmem:[%s5438_s4 + $0x3e8] sm:$0xff]  ;;  %v2243_v21 = vld [vmem:[%s5438_s4 + $0x400] sm:$0xff] }
 0x782   :  { %v1825_v47 = vsel %vm712_vm3, %v1822_v23, %v1824_v32  ;;  %v1811_v48 = vsel %vm692_vm4, %v1809_v35, %v1801_v31  ;;  %v1810_v37 = vsel %vm692_vm4, %v1807_v30, %v1809_v35  ;;  %v1827_v39 = vsel %vm712_vm3, %v1824_v32, %v1826_v34  ;;  %v2138_v30 = vld [vmem:[%s5438_s4 + $0x3e0] sm:$0xff] }
 0x783   :  { %1842 = vrot.lane.b32.xlu0 %v1798_v12, %s4337_s29  ;;  %v1835_v41 = vsel %vm4690_vm5, %v1825_v47, 0.0  ;;  %v1837_v43 = vsel %vm4704_vm6, %v1833_v38, 0.0  ;;  %v1817_v44 = vsel %vm4722_vm7, %v1816_v36, 0.0  ;;  %v1819_v4 = vsel %vm4735_vm10, %v1810_v37, 0.0 }
 0x784   :  { %1856 = vrot.lane.b32.xlu1 %v1835_v41, %s4338_s30  ;;  %v4091_v23 = vpack.c.bf16 %v2242_v11, %v2241_v9  ;;  %v4087_v45 = vpack.c.bf16 %v2139_v33, %v2138_v30  ;;  %v4095_v60 = vpack.c.bf16 %v2244_v46, %v2243_v21 }
 0x786   :  { %4092 = vmatprep.subr.bf16.mxu0 %v4091_v23 }
 0x787   :  { %1858 = vrot.lane.b32.xlu0 %v1827_v39, %s4338_s30 }
 0x788   :  { %1860 = vrot.lane.b32.xlu1 %v1837_v43, %s4338_s30 }
 0x78b   :  { %1886 = vrot.lane.b32.xlu0 %v4784_v2, %s4338_s30 }
 0x78c   :  { %1888 = vrot.lane.b32.xlu1 %v4781_v63, %s4338_s30 }
 0x78f   :  { %1890 = vrot.lane.b32.xlu0 %v4792_v22, %s4338_s30 }
 0x790   :  { %1892 = vrot.lane.b32.xlu1 %v4789_v19, %s4338_s30 }
 0x793   :  { %2007 = vrot.lane.b32.xlu0 %v4803_v42, %s4338_s30 }
 0x794   :  { %2009 = vrot.lane.b32.xlu1 %v4800_v40, %s4338_s30 }
 0x797   :  { %2011 = vrot.lane.b32.xlu0 %v4811_v55, %s4338_s30 }
 0x798   :  { %2013 = vrot.lane.b32.xlu1 %v4808_v49, %s4338_s30 }
 0x79b   :  { %2346 = vrot.lane.b32.xlu0 %v4644_v16, %s4337_s29 }
 0x79c   :  { %2348 = vrot.lane.b32.xlu1 %v4665_v28, %s4337_s29 }
 0x7ec   :  { %v1841_v52 = vpop.permute.xlu1 %1840 }
 0x7ed   :  { %v1839_v61 = vpop.permute.xlu0 %1838  ;;  %v1867_v16 = vsel %vm39_vm1, %v1808_v29, %v1841_v52 }
 0x7ee   :  { %v1866_v53 = vsel %vm39_vm1, %v1817_v44, %v1839_v61 }
 0x7f1   :  { %v1845_v56 = vpop.permute.xlu1 %1844  ;;  %v1855_v57 = vpop.permute.xlu0 %1854 }
 0x7f2   :  { %v1870_v58 = vsel %vm762_vm8, %v1866_v53, %v1855_v57  ;;  %v1869_v13 = vsel %vm39_vm1, %v1811_v48, %v1845_v56 }
 0x7f3   :  { %3681 = vmatprep.mubr.msk.f32.mxu1 %vm779_vm9, %v1870_v58  ;;  %3711 = vmatprep.mubr.msk.f32.mxu0 %vm779_vm9, %v1870_v58 }
 0x7f5   :  { %v1843_v1 = vpop.permute.xlu0 %1842 }
 0x7f6   :  { %v1857_v62 = vpop.permute.xlu1 %1856  ;;  %v1868_v7 = vsel %vm39_vm1, %v1819_v4, %v1843_v1 }
 0x7f7   :  { %v1871_v28 = vsel %vm762_vm8, %v1867_v16, %v1857_v62 }
 0x7f8   :  { %3682 = vmatmul.mubr.msk.f32.vlgmr.msra.gmra.mrb[18].mxu1 %vm779_vm9, %v1871_v28  ;;  %3712 = vmatmul.mubr.msk.f32.vlgmr.msra.gmra.mrb[28].mxu0 %vm779_vm9, %v1871_v28 }
 0x7f9   :  { %v1859_v18 = vpop.permute.xlu0 %1858  ;;  %4086 = vmatpush3.bf16.msra.mxu1 %v4083_v5  ;;  %4094 = vmatpush3.bf16.msra.mxu0 %v4091_v23 }
 0x7fa   :  { %v1872_v3 = vsel %vm762_vm8, %v1868_v7, %v1859_v18  ;;  %v1861_v10 = vpop.permute.xlu1 %1860  ;;  %4088 = vmatprep.subr.bf16.mxu1 %v4087_v45  ;;  %4096 = vmatprep.subr.bf16.mxu0 %v4095_v60 }
 0x7fb   :  { %v1873_v50 = vsel %vm762_vm8, %v1869_v13, %v1861_v10  ;;  %3684 = vmatprep.mubr.msk.f32.mxu1 %vm779_vm9, %v1872_v3  ;;  %3714 = vmatprep.mubr.msk.f32.mxu0 %vm779_vm9, %v1872_v3 }
 0x7fc   :  { %3685 = vmatmul.mubr.msk.f32.gmra.mrb[20].mxu1 %vm779_vm9, %v1873_v50  ;;  %3715 = vmatmul.mubr.msk.f32.gmra.mrb[30].mxu0 %vm779_vm9, %v1873_v50 }
 0x7fd   :  { %4090 = vmatpush3.bf16.msra.mxu1 %v4087_v45  ;;  %4098 = vmatpush3.bf16.msra.mxu0 %v4095_v60  ;;  %v1887_v29 = vpop.permute.xlu0 %1886 }
 0x7fe   :  { %v1889_v12 = vpop.permute.xlu1 %1888 }
 0x801   :  { %v1891_v41 = vpop.permute.xlu0 %1890 }
 0x802   :  { %v1893_v48 = vpop.permute.xlu1 %1892 }
 0x805   :  { %v2008_v4 = vpop.permute.xlu0 %2007 }
 0x806   :  { %v2010_v28 = vpop.permute.xlu1 %2009 }
 0x809   :  { %v2012_v50 = vpop.permute.xlu0 %2011 }
 0x80a   :  { %v2014_v3 = vpop.permute.xlu1 %2013 }
 0x8cb   :  { %v3683_v31 = vpop.f32.mrb[18].mxu1  ;;  %v3713_v32 = vpop.f32.mrb[28].mxu0 }
 0x8cc   :  { %v1982_v34 = vadd.f32 %v3683_v31, %v1889_v12  ;;  %v1976_v35 = vpop.f32.mrb[19].mxu1  ;;  %v2085_v36 = vpop.f32.mrb[29].mxu0  ;;  %v2091_v7 = vadd.f32 %v3713_v32, %v2010_v28 }
 0x8cd   :  { %v1977_v47 = vadd.f32 %v1976_v35, %v1887_v29  ;;  %v2086_v18 = vadd.f32 %v2085_v36, %v2008_v4 }
 0x8ce   :  { %v2105_v37 = vsub.f32 0.0, %v1982_v34 }
 0x8cf   :  { %v2104_v38 = vsub.f32 0.0, %v1977_v47  ;;  %v3686_v39 = vpop.f32.mrb[20].mxu1  ;;  %v3716_v43 = vpop.f32.mrb[30].mxu0 }
 0x8d0   :  { %v2110_v52 = vmul.f32 1.442695, %v2105_v37  ;;  %v1992_v61 = vadd.f32 %v3686_v39, %v1893_v48  ;;  %v1986_v44 = vpop.f32.mrb[21].mxu1  ;;  %v2095_v53 = vpop.f32.mrb[31].mxu0  ;;  %v2101_v0 = vadd.f32 %v3716_v43, %v2014_v3  ;;  %v2431_v48 = vld [vmem:[%s5438_s4 + $0x418] sm:$0xff]  ;;  %v2551_v37 = vld [vmem:[%s5438_s4 + $0x470] sm:$0xff] }
 0x8d1   :  { %v2108_v56 = vmul.f32 1.442695, %v2104_v38  ;;  %v1987_v57 = vadd.f32 %v1986_v44, %v1891_v41  ;;  %v2096_v5 = vadd.f32 %v2095_v53, %v2012_v50  ;;  %v2430_v41 = vld [vmem:[%s5438_s4 + $0x410] sm:$0xff]  ;;  %v2552_v39 = vld [vmem:[%s5438_s4 + $0x478] sm:$0xff]  ;;  %v2432_v43 = vld [vmem:[%s5438_s4 + $0x420] sm:$0xff] }
 0x8d2   :  { %4262 = vpow2.f32 %v2110_v52  ;;  %v2107_v58 = vsub.f32 0.0, %v1992_v61  ;;  %v4099_v38 = vpack.c.bf16 %v2431_v48, %v2430_v41  ;;  %v2433_v52 = vld [vmem:[%s5438_s4 + $0x428] sm:$0xff]  ;;  %v4123_v61 = vpack.c.bf16 %v2552_v39, %v2551_v37  ;;  %v2553_v53 = vld [vmem:[%s5438_s4 + $0x480] sm:$0xff] }
 0x8d3   :  { %4264 = vpow2.f32 %v2108_v56  ;;  %v2106_v1 = vsub.f32 0.0, %v1987_v57  ;;  %v4103_v44 = vpack.c.bf16 %v2433_v52, %v2432_v43  ;;  %v2554_v56 = vld [vmem:[%s5438_s4 + $0x488] sm:$0xff]  ;;  %v2434_v57 = vld [vmem:[%s5438_s4 + $0x430] sm:$0xff] }
 0x8d4   :  { %v2114_v16 = vmul.f32 1.442695, %v2107_v58  ;;  %4100 = vmatprep.subr.bf16.mxu1 %v4099_v38  ;;  %v4127_v58 = vpack.c.bf16 %v2554_v56, %v2553_v53  ;;  %4124 = vmatprep.subr.bf16.mxu0 %v4123_v61  ;;  %v2558_v3 = vld [vmem:[%s5438_s4 + $0x4a8] sm:$0xff] }
 0x8d5   :  { %v2112_v62 = vmul.f32 1.442695, %v2106_v1  ;;  %v2435_v1 = vld [vmem:[%s5438_s4 + $0x438] sm:$0xff] }
 0x8d6   :  { %4266 = vpow2.f32 %v2114_v16  ;;  %v2555_v16 = vld [vmem:[%s5438_s4 + $0x490] sm:$0xff]  ;;  %v4107_v28 = vpack.c.bf16 %v2435_v1, %v2434_v57  ;;  %v2349_v57 = vpop.permute.xlu1 %2348 }
 0x8d7   :  { %4268 = vpow2.f32 %v2112_v62  ;;  %v2556_v62 = vld [vmem:[%s5438_s4 + $0x498] sm:$0xff] }
 0x8d8   :  { %4270 = vtanh.f32 %v2091_v7  ;;  %v4131_v4 = vpack.c.bf16 %v2556_v62, %v2555_v16  ;;  %v2436_v7 = vld [vmem:[%s5438_s4 + $0x440] sm:$0xff] }
 0x8d9   :  { %4272 = vtanh.f32 %v2086_v18  ;;  %v2437_v18 = vld [vmem:[%s5438_s4 + $0x448] sm:$0xff] }
 0x8dc   :  { %v4263_v13 = vpop.eup %4262 }
 0x8dd   :  { %v4265_v10 = vpop.eup %4264  ;;  %v2117_v14 = vadd.f32 1.0, %v4263_v13  ;;  %v2557_v13 = vld [vmem:[%s5438_s4 + $0x4a0] sm:$0xff] }
 0x8de   :  { %v2116_v9 = vadd.f32 1.0, %v4265_v10  ;;  %v4111_v10 = vpack.c.bf16 %v2437_v18, %v2436_v7  ;;  %v4135_v50 = vpack.c.bf16 %v2558_v3, %v2557_v13 }
 0x8df   :  { %4274 = vrcp.f32 %v2117_v14  ;;  %v2142_v14 = vsub.s32 2, %v4603_v59 }
 0x8e0   :  { %v4267_v11 = vpop.eup %4266  ;;  %4276 = vrcp.f32 %v2116_v9  ;;  %v2438_v9 = vld [vmem:[%s5438_s4 + $0x450] sm:$0xff] }
 0x8e1   :  { %v4269_v23 = vpop.eup %4268  ;;  %v2119_v30 = vadd.f32 1.0, %v4267_v11  ;;  %4278 = vtanh.f32 %v2101_v0  ;;  %v2143_v0 = vrot.slane %v4874_v15, %v2142_v14  ;;  %v2559_v11 = vld [vmem:[%s5438_s4 + $0x4b0] sm:$0xff] }
 0x8e2   :  { %v2118_v33 = vadd.f32 1.0, %v4269_v23  ;;  %4280 = vtanh.f32 %v2096_v5  ;;  %v4271_v21 = vpop.eup %4270  ;;  %v2439_v5 = vld [vmem:[%s5438_s4 + $0x458] sm:$0xff] }
 0x8e3   :  { %4282 = vrcp.f32 %v2119_v30  ;;  %v4273_v45 = vpop.eup %4272  ;;  %v4115_v23 = vpack.c.bf16 %v2439_v5, %v2438_v9  ;;  %v2560_v30 = vld [vmem:[%s5438_s4 + $0x4b8] sm:$0xff] }
 0x8e4   :  { %4284 = vrcp.f32 %v2118_v33  ;;  %v4139_v33 = vpack.c.bf16 %v2560_v30, %v2559_v11 }
 0x8e9   :  { %v4275_v46 = vpop.eup %4274 }
 0x8ea   :  { %v4277_v60 = vpop.eup %4276  ;;  %v2133_v29 = vmul.f32 %v4275_v46, %v4271_v21  ;;  %v2440_v46 = vld [vmem:[%s5438_s4 + $0x460] sm:$0xff] }
 0x8eb   :  { %v4279_v12 = vpop.eup %4278  ;;  %v2132_v31 = vmul.f32 %v4277_v60, %v4273_v45  ;;  %v2441_v60 = vld [vmem:[%s5438_s4 + $0x468] sm:$0xff] }
 0x8ec   :  { %v4281_v32 = vpop.eup %4280 }
 0x8ed   :  { %v4283_v34 = vpop.eup %4282  ;;  %3725 = vmatprep.mubr.msk.f32.mxu1 %vm39_vm1, %v2132_v31  ;;  %3739 = vmatprep.mubr.msk.f32.mxu0 %vm39_vm1, %v2132_v31  ;;  %v4119_v31 = vpack.c.bf16 %v2441_v60, %v2440_v46 }
 0x8ee   :  { %v4285_v35 = vpop.eup %4284  ;;  %3726 = vmatmul.mubr.msk.f32.vlgmr.msra.gmra.mrb[22].mxu1 %vm39_vm1, %v2133_v29  ;;  %3740 = vmatmul.mubr.msk.f32.vlgmr.msra.gmra.mrb[20].mxu0 %vm39_vm1, %v2133_v29  ;;  %v2135_v36 = vmul.f32 %v4283_v34, %v4279_v12  ;;  %v2561_v29 = vld [vmem:[%s5438_s4 + $0x4c0] sm:$0xff] }
 0x8ef   :  { %v2134_v47 = vmul.f32 %v4285_v35, %v4281_v32  ;;  %4102 = vmatpush3.bf16.msra.mxu1 %v4099_v38  ;;  %4126 = vmatpush3.bf16.msra.mxu0 %v4123_v61  ;;  %v2562_v32 = vld [vmem:[%s5438_s4 + $0x4c8] sm:$0xff]  ;;  %v2347_v38 = vpop.permute.xlu0 %2346 }
 0x8f0   :  { %4104 = vmatprep.subr.bf16.mxu1 %v4103_v44  ;;  %4128 = vmatprep.subr.bf16.mxu0 %v4127_v58  ;;  %v4143_v35 = vpack.c.bf16 %v2562_v32, %v2561_v29  ;;  %v2693_v29 = vld [vmem:[%s5438_s4 + $0x4f8] sm:$0xff]  ;;  %v2695_v32 = vld [vmem:[%s5438_s4 + $0x508] sm:$0xff] }
 0x8f1   :  { %3728 = vmatprep.mubr.msk.f32.mxu1 %vm39_vm1, %v2134_v47  ;;  %3742 = vmatprep.mubr.msk.f32.mxu0 %vm39_vm1, %v2134_v47 }
 0x8f2   :  { %3729 = vmatmul.mubr.msk.f32.gmra.mrb[24].mxu1 %vm39_vm1, %v2135_v36  ;;  %3743 = vmatmul.mubr.msk.f32.gmra.mrb[22].mxu0 %vm39_vm1, %v2135_v36 }
 0x8f3   :  { %4106 = vmatpush3.bf16.msra.mxu1 %v4103_v44  ;;  %4130 = vmatpush3.bf16.msra.mxu0 %v4127_v58 }
 0x8f4   :  { %4108 = vmatprep.subr.bf16.mxu1 %v4107_v28  ;;  %4132 = vmatprep.subr.bf16.mxu0 %v4131_v4 }
 0x8f7   :  { %4110 = vmatpush3.bf16.msra.mxu1 %v4107_v28  ;;  %4134 = vmatpush3.bf16.msra.mxu0 %v4131_v4 }
 0x8f8   :  { %4112 = vmatprep.subr.bf16.mxu1 %v4111_v10  ;;  %4136 = vmatprep.subr.bf16.mxu0 %v4135_v50 }
 0x8fb   :  { %4114 = vmatpush3.bf16.msra.mxu1 %v4111_v10  ;;  %4138 = vmatpush3.bf16.msra.mxu0 %v4135_v50 }
 0x8fc   :  { %4116 = vmatprep.subr.bf16.mxu1 %v4115_v23  ;;  %4140 = vmatprep.subr.bf16.mxu0 %v4139_v33 }
 0x8ff   :  { %4118 = vmatpush3.bf16.msra.mxu1 %v4115_v23  ;;  %4142 = vmatpush3.bf16.msra.mxu0 %v4139_v33 }
 0x900   :  { %4120 = vmatprep.subr.bf16.mxu1 %v4119_v31  ;;  %4144 = vmatprep.subr.bf16.mxu0 %v4143_v35 }
 0x903   :  { %4122 = vmatpush3.bf16.msra.mxu1 %v4119_v31  ;;  %4146 = vmatpush3.bf16.msra.mxu0 %v4143_v35  ;;  %v2694_v31 = vld [vmem:[%s5438_s4 + $0x500] sm:$0xff]  ;;  %v2805_v35 = vld [vmem:[%s5438_s4 + $0xb0] sm:$0xff] }
 0x9c1   :  { %v3727_v21 = vpop.f32.mrb[22].mxu1 }
 0x9c2   :  { %v2228_v15 = vadd.f32 %v3727_v21, %v2143_v0  ;;  %v2222_v45 = vpop.f32.mrb[23].mxu1 }
 0x9c3   :  { %v2223_v12 = vadd.f32 %v2222_v45, %v2143_v0 }
 0x9c4   :  { %v2335_v34 = vadd.f32 %v2228_v15, %v5114_v8 }
 0x9c5   :  { %v2334_v36 = vadd.f32 %v2223_v12, %v5116_v20  ;;  %v3730_v47 = vpop.f32.mrb[24].mxu1  ;;  %v4147_v12 = vpack.c.bf16 %v2693_v29, %v2692_v54  ;;  %v2807_v29 = vld [vmem:[%s5438_s4 + $0xc0] sm:$0xff] }
 0x9c6   :  { %v2339_v41 = vmul.f32 0.70710677, %v2335_v34  ;;  %v2238_v48 = vadd.f32 %v3730_v47, %v2143_v0  ;;  %v2232_v37 = vpop.f32.mrb[25].mxu1  ;;  %v4151_v34 = vpack.c.bf16 %v2695_v32, %v2694_v31  ;;  %v2915_v32 = vld [vmem:[%s5438_s4 + $0xd8] sm:$0xff] }
 0x9c7   :  { %v2338_v39 = vmul.f32 0.70710677, %v2334_v36  ;;  %v2233_v43 = vadd.f32 %v2232_v37, %v2143_v0  ;;  %4148 = vmatprep.subr.bf16.mxu0 %v4147_v12  ;;  %v2806_v36 = vld [vmem:[%s5438_s4 + $0xb8] sm:$0xff] }
 0x9c8   :  { %v2337_v52 = vadd.f32 %v2238_v48, %v5123_v26  ;;  %v2353_v61 = vadd.f32 %v2347_v38, %v2339_v41  ;;  %v4155_v47 = vpack.c.bf16 %v2806_v36, %v2805_v35  ;;  %v677_v36 = vld [vmem:[%s5438_s4 + $0x108] sm:$0xf] }
 0x9c9   :  { %v2336_v44 = vadd.f32 %v2233_v43, %v5126_v24  ;;  %v2352_v8 = vadd.f32 %v2347_v38, %v2338_v39 }
 0x9ca   :  { %v2341_v53 = vmul.f32 0.70710677, %v2337_v52  ;;  %2396 = vrot.lane.b32.xlu1 %v2353_v61, %s4337_s29  ;;  %v2378_v20 = vrot.slane %v2353_v61, 2  ;;  %v2363_v56 = vrot.slane %v2353_v61, 6  ;;  %4156 = vmatprep.subr.bf16.mxu1 %v4155_v47 }
 0x9cb   :  { %v2340_v58 = vmul.f32 0.70710677, %v2336_v44  ;;  %2394 = vrot.lane.b32.xlu0 %v2352_v8, %s4337_s29  ;;  %v2377_v1 = vrot.slane %v2352_v8, 2  ;;  %v2362_v16 = vrot.slane %v2352_v8, 6 }
 0x9cc   :  { %v2355_v62 = vadd.f32 %v2349_v57, %v2341_v53 }
 0x9cd   :  { %v2354_v28 = vadd.f32 %v2349_v57, %v2340_v58  ;;  %v2379_v4 = vsel %vm1256_vm11, %v2377_v1, %v2378_v20  ;;  %v2364_v26 = vsel %vm1236_vm12, %v2362_v16, %v2363_v56 }
 0x9ce   :  { %2400 = vrot.lane.b32.xlu1 %v2355_v62, %s4337_s29  ;;  %v2357_v24 = vrot.slane %v2355_v62, 6  ;;  %v2382_v7 = vrot.slane %v2355_v62, 2 }
 0x9cf   :  { %2410 = vrot.lane.b32.xlu0 %v2379_v4, %s4338_s30  ;;  %v2380_v18 = vrot.slane %v2354_v28, 2  ;;  %v2365_v13 = vrot.slane %v2354_v28, 6 }
 0x9d0   :  { %v2389_v3 = vsel %vm1256_vm11, %v2382_v7, %v2377_v1  ;;  %v2372_v10 = vsel %vm1236_vm12, %v2357_v24, %v2362_v16 }
 0x9d1   :  { %v2381_v50 = vsel %vm1256_vm11, %v2378_v20, %v2380_v18  ;;  %v2383_v0 = vsel %vm1256_vm11, %v2380_v18, %v2382_v7  ;;  %v2367_v5 = vsel %vm1236_vm12, %v2365_v13, %v2357_v24  ;;  %v2366_v11 = vsel %vm1236_vm12, %v2363_v56, %v2365_v13 }
 0x9d2   :  { %v2391_v9 = vsel %vm4930_vm13, %v2381_v50, 0.0  ;;  %v2393_v23 = vsel %vm4944_vm14, %v2389_v3, 0.0  ;;  %v2375_v51 = vsel %vm4989_vm0, %v2366_v11, 0.0 }
 0x9d3   :  { %2412 = vrot.lane.b32.xlu1 %v2391_v9, %s4338_s30  ;;  %2398 = vrot.lane.b32.xlu0 %v2354_v28, %s4337_s29 }
 0x9d7   :  { %2416 = vrot.lane.b32.xlu1 %v2393_v23, %s4338_s30  ;;  %2414 = vrot.lane.b32.xlu0 %v2383_v0, %s4338_s30  ;;  %s4340_s30 = smov [#allocation2]  }
 0x9d8   :  { %s3030_s16 = sshll.u32 %s4340_s30, 4  ;;  %s3031_s16 = int_to_ptr.vmem [resolvable:$true] %s3030_s16 }
 0x9d9   :  { %p4315_p1 = scmp.lt.s32.totalorder %s3031_s16, %s3031_s16 }
 0x9db   :  { %2444 = vrot.lane.b32.xlu1 %v4781_v63, %s4337_s29  ;;  %2442 = vrot.lane.b32.xlu0 %v4784_v2, %s4337_s29 }
 0x9df   :  { %2448 = vrot.lane.b32.xlu1 %v4789_v19, %s4337_s29  ;;  %2446 = vrot.lane.b32.xlu0 %v4792_v22, %s4337_s29  ;;  %v2373_v19 = vsel %vm4976_vm15, %v2372_v10, 0.0 }
 0x9e3   :  { %2565 = vrot.lane.b32.xlu1 %v4800_v40, %s4337_s29  ;;  %2563 = vrot.lane.b32.xlu0 %v4803_v42, %s4337_s29 }
 0x9e7   :  { %2569 = vrot.lane.b32.xlu1 %v4808_v49, %s4337_s29  ;;  %2567 = vrot.lane.b32.xlu0 %v4811_v55, %s4337_s29 }
 0xa3c   :  { %v2397_v63 = vpop.permute.xlu1 %2396 }
 0xa3d   :  { %v2395_v2 = vpop.permute.xlu0 %2394  ;;  %v2423_v42 = vsel %vm39_vm1, %v2364_v26, %v2397_v63 }
 0xa3e   :  { %v2422_v22 = vsel %vm39_vm1, %v2373_v19, %v2395_v2 }
 0xa40   :  { %v2401_v25 = vpop.permute.xlu1 %2400 }
 0xa41   :  { %v2411_v27 = vpop.permute.xlu0 %2410  ;;  %v2425_v33 = vsel %vm39_vm1, %v2367_v5, %v2401_v25 }
 0xa42   :  { %v2426_v40 = vsel %vm762_vm8, %v2422_v22, %v2411_v27 }
 0xa43   :  { %3769 = vmatprep.mubr.msk.f32.mxu1 %vm779_vm9, %v2426_v40  ;;  %3799 = vmatprep.mubr.msk.f32.mxu0 %vm779_vm9, %v2426_v40 }
 0xa45   :  { %v2413_v49 = vpop.permute.xlu1 %2412  ;;  %v2399_v30 = vpop.permute.xlu0 %2398 }
 0xa46   :  { %v2427_v55 = vsel %vm762_vm8, %v2423_v42, %v2413_v49  ;;  %v2424_v21 = vsel %vm39_vm1, %v2375_v51, %v2399_v30 }
 0xa47   :  { %3770 = vmatmul.mubr.msk.f32.vlgmr.msra.gmra.mrb[26].mxu1 %vm779_vm9, %v2427_v55  ;;  %3800 = vmatmul.mubr.msk.f32.vlgmr.msra.gmra.mrb[32].mxu0 %vm779_vm9, %v2427_v55 }
 0xa48   :  { %4150 = vmatpush3.bf16.msra.mxu0 %v4147_v12  ;;  %4158 = vmatpush3.bf16.msra.mxu1 %v4155_v47  ;;  %v2808_v12 = vld [vmem:[%s5438_s4 + $0xc8] sm:$0xff]  ;;  %v1118_v47 = vrot.slane %v677_v36, %v4625_v6 }
 0xa49   :  { %v2417_v15 = vpop.permute.xlu1 %2416  ;;  %v2415_v45 = vpop.permute.xlu0 %2414  ;;  %4152 = vmatprep.subr.bf16.mxu0 %v4151_v34  ;;  %v4159_v31 = vpack.c.bf16 %v2808_v12, %v2807_v29 }
 0xa4a   :  { %v2429_v46 = vsel %vm762_vm8, %v2425_v33, %v2417_v15  ;;  %v2428_v60 = vsel %vm762_vm8, %v2424_v21, %v2415_v45 }
 0xa4b   :  { %3772 = vmatprep.mubr.msk.f32.mxu1 %vm779_vm9, %v2428_v60  ;;  %3802 = vmatprep.mubr.msk.f32.mxu0 %vm779_vm9, %v2428_v60 }
 0xa4c   :  { %3773 = vmatmul.mubr.msk.f32.gmra.mrb[28].mxu1 %vm779_vm9, %v2429_v46  ;;  %3803 = vmatmul.mubr.msk.f32.gmra.mrb[34].mxu0 %vm779_vm9, %v2429_v46 }
 0xa4d   :  { %4154 = vmatpush3.bf16.msra.mxu0 %v4151_v34  ;;  %v2445_v41 = vpop.permute.xlu1 %2444  ;;  %v2443_v48 = vpop.permute.xlu0 %2442  ;;  %4160 = vmatprep.subr.bf16.mxu1 %v4159_v31  ;;  %v2916_v34 = vld [vmem:[%s5438_s4 + $0xe0] sm:$0xff] }
 0xa4e   :  { %4162 = vmatpush3.bf16.msra.mxu1 %v4159_v31  ;;  %v4163_v35 = vpack.c.bf16 %v2916_v34, %v2915_v32 }
 0xa50   :  { %4164 = vmatprep.subr.bf16.mxu1 %v4163_v35 }
 0xa51   :  { %v2449_v8 = vpop.permute.xlu1 %2448  ;;  %v2447_v53 = vpop.permute.xlu0 %2446 }
 0xa55   :  { %v2566_v13 = vpop.permute.xlu1 %2565  ;;  %v2564_v3 = vpop.permute.xlu0 %2563 }
 0xa59   :  { %v2570_v5 = vpop.permute.xlu1 %2569  ;;  %v2568_v23 = vpop.permute.xlu0 %2567 }
 0xb1a   :  { %v3771_v37 = vpop.f32.mrb[26].mxu1  ;;  %v3801_v38 = vpop.f32.mrb[32].mxu0 }
 0xb1b   :  { %v2538_v39 = vadd.f32 %v3771_v37, %v2445_v41  ;;  %v2532_v43 = vpop.f32.mrb[27].mxu1  ;;  %v2641_v52 = vpop.f32.mrb[33].mxu0  ;;  %v2647_v10 = vadd.f32 %v3801_v38, %v2566_v13  ;;  %v1692_v41 = vrot.slane %v677_v36, %v4647_v17  ;;  %v2698_v37 = vsub.s32 3, %v4603_v59 }
 0xb1c   :  { %v2533_v61 = vadd.f32 %v2532_v43, %v2443_v48  ;;  %v2642_v50 = vadd.f32 %v2641_v52, %v2564_v3  ;;  %v2248_v48 = vrot.slane %v677_v36, %v2142_v14 }
 0xb1d   :  { %v2661_v44 = vsub.f32 0.0, %v2538_v39  ;;  %v4175_v38 = vadd.f32 %v1692_v41, %v1118_v47  ;;  %v2699_v39 = vrot.slane %v677_v36, %v2698_v37 }
 0xb1e   :  { %v2660_v20 = vsub.f32 0.0, %v2533_v61 }
 0xb1f   :  { %v2666_v56 = vmul.f32 1.442695, %v2661_v44  ;;  %v3774_v57 = vpop.f32.mrb[28].mxu1  ;;  %v3804_v58 = vpop.f32.mrb[34].mxu0  ;;  %v4176_v43 = vadd.f32 %v4175_v38, %v2248_v48 }
 0xb20   :  { %v2664_v1 = vmul.f32 1.442695, %v2660_v20  ;;  %v2548_v16 = vadd.f32 %v3774_v57, %v2449_v8  ;;  %v2542_v62 = vpop.f32.mrb[29].mxu1  ;;  %v2651_v28 = vpop.f32.mrb[35].mxu0  ;;  %v2657_v2 = vadd.f32 %v3804_v58, %v2570_v5 }
 0xb21   :  { %4286 = vpow2.f32 %v2666_v56  ;;  %v2543_v4 = vadd.f32 %v2542_v62, %v2447_v53  ;;  %v2652_v19 = vadd.f32 %v2651_v28, %v2568_v23  ;;  %v4177_v52 = vadd.f32 %v4176_v43, %v2699_v39  ;;  %v3121_v28 = vld [vmem:[%s5438_s4 + $0xd0] ss:$0 sm:$0xff] }
 0xb22   :  { %4288 = vpow2.f32 %v2664_v1  ;;  %v2663_v26 = vsub.f32 0.0, %v2548_v16  ;;  %v2917_v1 = vld [vmem:[%s5438_s4 + $0xe8] sm:$0xff]  ;;  %v2918_v16 = vld [vmem:[%s5438_s4 + $0xf0] sm:$0xff] }
 0xb23   :  { %v2662_v24 = vsub.f32 0.0, %v2543_v4  ;;  %v4167_v62 = vpack.c.bf16 %v2918_v16, %v2917_v1 }
 0xb24   :  { %v2670_v7 = vmul.f32 1.442695, %v2663_v26 }
 0xb25   :  { %v2668_v18 = vmul.f32 1.442695, %v2662_v24 }
 0xb26   :  { %4290 = vpow2.f32 %v2670_v7 }
 0xb27   :  { %4292 = vpow2.f32 %v2668_v18 }
 0xb28   :  { %4294 = vtanh.f32 %v2647_v10 }
 0xb29   :  { %4296 = vtanh.f32 %v2642_v50 }
 0xb2b   :  { %v4287_v0 = vpop.eup %4286 }
 0xb2c   :  { %v4289_v9 = vpop.eup %4288  ;;  %v2673_v11 = vadd.f32 1.0, %v4287_v0 }
 0xb2d   :  { %v2672_v63 = vadd.f32 1.0, %v4289_v9 }
 0xb2e   :  { %4298 = vrcp.f32 %v2673_v11  ;;  %v3126_v11 = vld [vmem:[%s5438_s4 + $0xf8] ss:$0 sm:$0xff]  ;;  %s4310_s4 = scalar_lea.vmem %s3031_s16, 512 }
 0xb2f   :  { %4300 = vrcp.f32 %v2672_v63  ;;  %p4311_p0 = scmp.ne.s32.totalorder %s3031_s16, %s4310_s4  ;;  %p4316_p2 = scmp.lt.s32.totalorder %s4310_s4, %s4310_s4 }
 0xb30   :  { %v4291_v25 = vpop.eup %4290  ;;  %4302 = vtanh.f32 %v2657_v2 }
 0xb31   :  { %v4293_v22 = vpop.eup %4292  ;;  %v2675_v27 = vadd.f32 1.0, %v4291_v25  ;;  %4304 = vtanh.f32 %v2652_v19  ;;  %p4317_p3 = por %p4316_p2, %p4315_p1 }
 0xb32   :  { %v2674_v40 = vadd.f32 1.0, %v4293_v22  ;;  %v4295_v42 = vpop.eup %4294 }
 0xb33   :  { %4306 = vrcp.f32 %v2675_v27  ;;  %v4297_v49 = vpop.eup %4296  ;;  %p4318_p4 = pnand %p4317_p3, %p4311_p0 }
 0xb34   :  { %4308 = vrcp.f32 %v2674_v40 }
 0xb38   :  { %v4299_v30 = vpop.eup %4298 }
 0xb39   :  { %v4301_v55 = vpop.eup %4300  ;;  %v2689_v51 = vmul.f32 %v4299_v30, %v4295_v42 }
 0xb3a   :  { %v2688_v33 = vmul.f32 %v4301_v55, %v4297_v49  ;;  %v4303_v21 = vpop.eup %4302 }
 0xb3b   :  { %v4305_v15 = vpop.eup %4304 }
 0xb3c   :  { %3813 = vmatprep.mubr.msk.f32.mxu0 %vm39_vm1, %v2688_v33 }
 0xb3d   :  { %v4307_v45 = vpop.eup %4306  ;;  %3814 = vmatmul.mubr.msk.f32.vlgmr.msra.gmra.mrb[20].mxu0 %vm39_vm1, %v2689_v51 }
 0xb3e   :  { %v4309_v46 = vpop.eup %4308  ;;  %v2691_v60 = vmul.f32 %v4307_v45, %v4303_v21 }
 0xb3f   :  { %v2690_v54 = vmul.f32 %v4309_v46, %v4305_v15 }
 0xb41   :  { %3816 = vmatprep.mubr.msk.f32.mxu0 %vm39_vm1, %v2690_v54 }
 0xb42   :  { %3817 = vmatmul.mubr.msk.f32.gmra.mrb[22].mxu0 %vm39_vm1, %v2691_v60 }
 0xc10   :  { %v3815_v61 = vpop.f32.mrb[20].mxu0 }
 0xc11   :  { %v4174_v44 = vadd.f32 %v4177_v52, %v3815_v61  ;;  %v2778_v8 = vpop.f32.mrb[21].mxu0 }
 0xc12   :  { %v4178_v53 = vadd.f32 %v4177_v52, %v2778_v8 }
 0xc13   :  { %v2802_v56 = vmul.f32 0.5, %v4174_v44 }
 0xc14   :  { %v2801_v20 = vmul.f32 0.5, %v4178_v53 }
 0xc15   :  { %v3818_v57 = vpop.f32.mrb[22].mxu0 }
 0xc16   :  { %v4182_v58 = vadd.f32 %v4177_v52, %v3818_v57  ;;  %v2788_v6 = vpop.f32.mrb[23].mxu0  ;;  %3827 = vmatprep.mubr.msk.f32.mxu1 %vm39_vm1, %v2801_v20 }
 0xc17   :  { %v4186_v17 = vadd.f32 %v4177_v52, %v2788_v6  ;;  %3828 = vmatmul.mubr.msk.f32.vlgmr.msra.gmra.mrb[30].mxu1 %vm39_vm1, %v2802_v56 }
 0xc18   :  { %4166 = vmatpush3.bf16.msra.mxu1 %v4163_v35  ;;  %v2804_v14 = vmul.f32 0.5, %v4182_v58 }
 0xc19   :  { %v2803_v59 = vmul.f32 0.5, %v4186_v17  ;;  %4168 = vmatprep.subr.bf16.mxu1 %v4167_v62 }
 0xc1b   :  { %3830 = vmatprep.mubr.msk.f32.mxu1 %vm39_vm1, %v2803_v59 }
 0xc1c   :  { %3831 = vmatmul.mubr.msk.f32.gmra.mrb[32].mxu1 %vm39_vm1, %v2804_v14 }
 0xc1d   :  { %4170 = vmatpush3.bf16.msra.mxu1 %v4167_v62 }
 0xcea   :  { %v3829_v4 = vpop.f32.mrb[30].mxu1 }
 0xceb   :  { %v2898_v26 = vadd.f32 %v3829_v4, %v3121_v28  ;;  %v2892_v24 = vpop.f32.mrb[31].mxu1 }
 0xcec   :  { %v2893_v7 = vadd.f32 %v3121_v28, %v2892_v24 }
 0xced   :  { %v2912_v13 = vmax.f32 %v2898_v26, 0.0 }
 0xcee   :  { %v2911_v18 = vmax.f32 %v2893_v7, 0.0 }
 0xcef   :  { %v3832_v3 = vpop.f32.mrb[32].mxu1 }
 0xcf0   :  { %v2908_v10 = vadd.f32 %v3832_v3, %v3121_v28  ;;  %v2902_v50 = vpop.f32.mrb[33].mxu1  ;;  %3841 = vmatprep.mubr.msk.f32.mxu1 %vm39_vm1, %v2911_v18 }
 0xcf1   :  { %v2903_v0 = vadd.f32 %v3121_v28, %v2902_v50  ;;  %3842 = vmatmul.mubr.msk.f32.vlgmr.msra.gmra.mrb[34].mxu1 %vm39_vm1, %v2912_v13 }
 0xcf2   :  { %v2914_v5 = vmax.f32 %v2908_v10, 0.0 }
 0xcf3   :  { %v2913_v9 = vmax.f32 %v2903_v0, 0.0 }
 0xcf5   :  { %3844 = vmatprep.mubr.msk.f32.mxu1 %vm39_vm1, %v2913_v9 }
 0xcf6   :  { %3845 = vmatmul.mubr.msk.f32.gmra.mrb[36].mxu1 %vm39_vm1, %v2914_v5 }
 0xdc4   :  { %v3843_v23 = vpop.f32.mrb[34].mxu1 }
 0xdc5   :  { %v3008_v63 = vadd.f32 %v3843_v23, %v3126_v11  ;;  %v3002_v2 = vpop.f32.mrb[35].mxu1 }
 0xdc6   :  { %v3003_v19 = vadd.f32 %v3126_v11, %v3002_v2 }
 0xdc7   :  { %3022 = vst.msk [vmem:[#allocation2 + $0x8] sm:$0xff] %vm39_vm1, %v3008_v63 }
 0xdc8   :  { %3021 = vst.msk [vmem:[#allocation2] sm:$0xff] %vm39_vm1, %v3003_v19 }
 0xdc9   :  { %v3846_v25 = vpop.f32.mrb[36].mxu1 }
 0xdca   :  { %v3018_v22 = vadd.f32 %v3846_v25, %v3126_v11  ;;  %v3012_v27 = vpop.f32.mrb[37].mxu1 }
 0xdcb   :  { %v3013_v40 = vadd.f32 %v3126_v11, %v3012_v27 }
 0xdcc   :  { %3024 = vst.msk [vmem:[#allocation2 + $0x18] sm:$0xff] %vm39_vm1, %v3018_v22 }
 0xdcd   :  { %3023 = vst.msk [vmem:[#allocation2 + $0x10] sm:$0xff] %vm39_vm1, %v3013_v40 }
 0xdce   :  { %4321 = shalt.err (!%p4318_p4)
}
 0xdcf   :  { %s4322_s19 = scalar_lea.hbm %s5439_s5, 512 }
 0xdd0   :  { %p4323_p5 = scmp.ne.s32.totalorder %s5439_s5, %s4322_s19  ;;  %p4326_p6 = scmp.lt.u32.totalorder %s4322_s19, %s5439_s5 }
 0xdd2   :  { %p4328_p7 = pnand %p4326_p6, %p4323_p5 }
 0xdd4   :  { %4331 = shalt.err (!%p4328_p7)
}
 0xdd5   :  { %s4341_s23 = smov 128   ;;  %s4342_s24 = smov 8  }
 0xdd6   :  { %3036 = dma.vmem_to_hbm [thread:$0]  %s3031_s16, 512, %s5439_s5, [#allocation3], %s4341_s23, %s4341_s23, %s4342_s24  }
 0xdd7   :  { %4332 = dma.done.wait [#allocation3], 512  }
 0xdd8   :  { %4333 = vsyncadd [#allocation3], 4294966784 }
 0xdd9   :  { %3040 = vsyncpa [#allocation3], 1 }

</bundles_post_ra>
